<compile_context>
chip_gen: v5e
topology: v5e:2x2
jax: 0.10.0
libtpu: 0.0.40
codegen_flags: <defaults>
</compile_context>

<pallas_src>
import functools

import jax
import jax.numpy as jnp
from jax.experimental import pallas as pl
from jax.experimental.pallas import tpu as pltpu

# ----------------------------- config ---------------------------------------
STEM_OUT = 64            # modified stem: Conv2d(1, 64, k=7, s=2, p=2, bias=False)
NC = 128                 # backbone feature width feeding the heads (synthetic)
HEADS_N = (168, 11, 7)   # n = [168, 11, 7]
HEADS_TOT = sum(HEADS_N)                     # 186
HEAD_PAD = 256                               # lane-dense (multiple of 128) head slab
K, STRIDE, PAD = 7, 2, 2
KK = K * K * 1                               # im2col row width (Cin = 1 after stem swap)
KK_PAD = 64                                  # contraction dim padded for clean layout
TM = 512                                     # im2col rows per grid step (was 128)


def _pick_act_dtype():
    # bf16 activations only where the EUP/VPU are natively bf16 (v6e / v7x);
    # f32 on v5e and anything unknown.
    try:
        kind = jax.devices()[0].device_kind.lower()
    except Exception:
        return jnp.float32
    if ("v6" in kind) or ("v7" in kind) or ("7x" in kind):
        return jnp.bfloat16
    return jnp.float32


# ----------------------------- fused Pallas kernel ---------------------------
def _swish(v):
    # Single EUP transcendental (tanh), numerically stable for any v.
    # sigmoid(v) = 0.5 * tanh(0.5 * v) + 0.5
    half = jnp.asarray(0.5, v.dtype)
    return v * (half * jnp.tanh(half * v) + half)


def _fused_kernel(patch_ref, ws_ref, wp_ref, wh_ref, bh_ref, out_ref, acc_ref,
                  *, hw_inv, act_dtype):
    m = pl.program_id(1)

    @pl.when(m == 0)
    def _():
        acc_ref[...] = jnp.zeros_like(acc_ref)

    # stem conv (im2col rows x [KK_PAD, 64]) + swish            [TM, 64]
    h = jnp.dot(patch_ref[...], ws_ref[...], preferred_element_type=jnp.float32)
    h = _swish(h.astype(act_dtype))

    # 1x1 channel projection to NC + swish                      [TM, NC]
    h = jnp.dot(h.astype(jnp.bfloat16), wp_ref[...],
                preferred_element_type=jnp.float32)
    h = _swish(h.astype(act_dtype)).astype(jnp.bfloat16)

    # global-average-pool: per-tile row sum done on the MXU (ones-vector
    # matmul, f32 accumulation) instead of a per-tile cross-sublane XLU reduce.
    # Zero-padded rows contribute exactly 0 (no bias/BN before the pool).
    ones = jnp.ones((1, TM), jnp.bfloat16)
    acc_ref[...] += jnp.dot(ones, h, preferred_element_type=jnp.float32)  # [1, NC]

    @pl.when(m == pl.num_programs(1) - 1)
    def _():
        pooled = acc_ref[...] * hw_inv                      # mean over true HW
        logits = jnp.dot(pooled.astype(jnp.bfloat16), wh_ref[...],
                         preferred_element_type=jnp.float32) + bh_ref[...]
        out_ref[...] = logits                               # [1, HEAD_PAD] lane-dense


def fused_forward(patches, w_stem, w_proj, w_head, b_head, *, hw_true, act_dtype):
    N, hw_pad, kk = patches.shape
    m_tiles = hw_pad // TM
    kernel = functools.partial(_fused_kernel, hw_inv=1.0 / float(hw_true),
                               act_dtype=act_dtype)
    out = pl.pallas_call(
        kernel,
        out_shape=jax.ShapeDtypeStruct((N, 1, HEAD_PAD), jnp.float32),
        grid_spec=pltpu.PrefetchScalarGridSpec(
            num_scalar_prefetch=0,
            grid=(N, m_tiles),
            in_specs=[
                # patch tile streams (double-buffered) while weights stay resident
                pl.BlockSpec((None, TM, kk), lambda b, m: (b, m, 0)),
                pl.BlockSpec((kk, STEM_OUT), lambda b, m: (0, 0)),
                pl.BlockSpec((STEM_OUT, NC), lambda b, m: (0, 0)),
                pl.BlockSpec((NC, HEAD_PAD), lambda b, m: (0, 0)),
                pl.BlockSpec((1, HEAD_PAD), lambda b, m: (0, 0)),
            ],
            out_specs=pl.BlockSpec((None, 1, HEAD_PAD), lambda b, m: (b, 0, 0)),
            scratch_shapes=[pltpu.VMEM((1, NC), jnp.float32)],
        ),
        compiler_params=pltpu.CompilerParams(
            dimension_semantics=("parallel", "arbitrary")),
    )(patches, w_stem, w_proj, w_head, b_head)
    return out.reshape(N, HEAD_PAD)


# ----------------------------- glue (plain JAX) ------------------------------
def init_params(key):
    ks = jax.random.split(key, 2 + 2 * len(HEADS_N))
    # Mimic: inp_w = pretrained 3-channel stem weight; stem.weight = mean(inp_w, dim=1, keepdim=True)
    w_stem3 = jax.random.normal(ks[0], (STEM_OUT, 3, K, K), jnp.float32) * 0.05
    w_stem4 = jnp.mean(w_stem3, axis=1, keepdims=True)              # [64, 1, 7, 7]
    # pre-reshape to MXU-friendly [KH*KW*Cin, Cout] matching im2col (kh, kw, cin)
    # order, then zero-pad the contraction dim 49 -> 64 for clean bf16 layout.
    w_stem = jnp.transpose(w_stem4, (2, 3, 1, 0)).reshape(KK, STEM_OUT)
    w_stem = jnp.pad(w_stem, ((0, KK_PAD - KK), (0, 0))).astype(jnp.bfloat16)
    w_proj = (jax.random.normal(ks[1], (STEM_OUT, NC), jnp.float32) * 0.05).astype(jnp.bfloat16)
    ws, bs = [], []
    for i, n in enumerate(HEADS_N):
        ws.append(jax.random.normal(ks[2 + 2 * i], (NC, n), jnp.float32) * 0.05)
        bs.append(jax.random.normal(ks[3 + 2 * i], (1, n), jnp.float32) * 0.01)
    # concatenate the three heads into one lane-dense padded slab
    w_head = jnp.concatenate(ws, axis=1)                            # [NC, 186]
    b_head = jnp.concatenate(bs, axis=1)                            # [1, 186]
    w_head = jnp.pad(w_head, ((0, 0), (0, HEAD_PAD - HEADS_TOT))).astype(jnp.bfloat16)
    b_head = jnp.pad(b_head, ((0, 0), (0, HEAD_PAD - HEADS_TOT)))   # f32
    return dict(w_stem=w_stem, w_proj=w_proj, w_head=w_head, b_head=b_head)


def im2col(x_nhwc, k, stride, pad):
    # TODO(synk): for real Bengali image sizes, build the 7x7 stride-2 patches
    # in-kernel from a VMEM image tile (shifted pl.ds views) instead of
    # materializing the ~49x-duplicated im2col tensor in HBM.
    N, H, W, Cin = x_nhwc.shape
    Ho = (H + 2 * pad - k) // stride + 1
    Wo = (W + 2 * pad - k) // stride + 1
    xp = jnp.pad(x_nhwc, ((0, 0), (pad, pad), (pad, pad), (0, 0)))
    cols = []
    for kh in range(k):
        for kw in range(k):
            cols.append(
                xp[:, kh:kh + stride * (Ho - 1) + 1:stride,
                      kw:kw + stride * (Wo - 1) + 1:stride, :]
            )
    patches = jnp.concatenate(cols, axis=-1)        # [N, Ho, Wo, k*k*Cin], (kh, kw, cin) order
    return patches.reshape(N, Ho * Wo, k * k * Cin), (Ho, Wo)


def forward(params, x_nchw, act_dtype):
    # NCHW (PyTorch convention) -> NHWC, cast to bf16 BEFORE im2col so the
    # duplicated patch tensor and padding passes move half the bytes.
    x = jnp.transpose(x_nchw, (0, 2, 3, 1)).astype(jnp.bfloat16)
    patches, (Ho, Wo) = im2col(x, K, STRIDE, PAD)   # [N, HW, KK] bf16
    N, HW, _ = patches.shape
    hw_pad = pl.cdiv(HW, TM) * TM
    # single fused pad: HW -> hw_pad rows, KK -> KK_PAD contraction lanes
    patches = jnp.pad(patches, ((0, 0), (0, hw_pad - HW), (0, KK_PAD - KK)))

    # TODO(synk): the pretrained EfficientNet MBConv stack is not reproducible
    # from the given module; extract_features is approximated by the modified
    # stem conv + a 1x1 projection conv (both with swish) up to NC channels.
    # TODO(synk): BengaliHead definition not provided; modeled as GAP +
    # dropout (identity in eval) + Linear(nc, n).
    out = fused_forward(patches, params["w_stem"], params["w_proj"],
                        params["w_head"], params["b_head"],
                        hw_true=HW, act_dtype=act_dtype)

    s1, s2 = HEADS_N[0], HEADS_N[0] + HEADS_N[1]
    return out[:, :s1], out[:, s1:s2], out[:, s2:HEADS_TOT]


# ----------------------------- main ------------------------------------------
if __name__ == "__main__":
    key = jax.random.PRNGKey(0)
    pkey, xkey = jax.random.split(key)
    params = init_params(pkey)
    act_dtype = _pick_act_dtype()

    # small shapes: batch=2, 1 input channel (per the modified stem), 32x32 image
    x = jax.random.normal(xkey, (2, 1, 32, 32), jnp.float32)

    fwd = jax.jit(functools.partial(forward, params, act_dtype=act_dtype))
    x1, x2, x3 = fwd(x)
    jax.block_until_ready((x1, x2, x3))

    assert x1.shape == (2, 168), x1.shape
    assert x2.shape == (2, 11), x2.shape
    assert x3.shape == (2, 7), x3.shape
    assert all(bool(jnp.all(jnp.isfinite(o))) for o in (x1, x2, x3))

    print("KERNEL_OK")
</pallas_src>

<mosaic_0001>
module attributes {stable_mosaic.version = 11 : i64} {
  func.func @_fused_kernel(%arg0: i32, %arg1: i32, %arg2: memref<1x512x64xbf16, #tpu.memory_space<vmem>>, %arg3: memref<64x64xbf16, #tpu.memory_space<vmem>>, %arg4: memref<64x128xbf16, #tpu.memory_space<vmem>>, %arg5: memref<128x256xbf16, #tpu.memory_space<vmem>>, %arg6: memref<1x256xf32, #tpu.memory_space<vmem>>, %arg7: memref<1x1x256xf32, #tpu.memory_space<vmem>>, %arg8: memref<1x128xf32, #tpu.memory_space<vmem>>) attributes {dimension_semantics = [#tpu.dimension_semantics<parallel>, #tpu.dimension_semantics<arbitrary>], iteration_bounds = array<i64: 2, 1>, scalar_prefetch = 0 : i64, scratch_operands = 1 : i64, tpu.core_type = #tpu.core_type<tc>, window_params = [{transform_indices = @transform_0, window_bounds = array<i64: 1, 512, 64>}, {pipeline_mode = #tpu.pipeline_mode<synchronous>, transform_indices = @transform_1, window_bounds = array<i64: 64, 64>}, {pipeline_mode = #tpu.pipeline_mode<synchronous>, transform_indices = @transform_2, window_bounds = array<i64: 64, 128>}, {pipeline_mode = #tpu.pipeline_mode<synchronous>, transform_indices = @transform_3, window_bounds = array<i64: 128, 256>}, {pipeline_mode = #tpu.pipeline_mode<synchronous>, transform_indices = @transform_4, window_bounds = array<i64: 1, 256>}, {transform_indices = @transform_5, window_bounds = array<i64: 1, 1, 256>}]} {
    %c0_i32 = arith.constant 0 : i32
    %0 = arith.cmpi eq, %arg1, %c0_i32 : i32
    %1 = arith.extui %0 : i1 to i32
    %c0_i32_0 = arith.constant 0 : i32
    %2 = arith.cmpi ne, %1, %c0_i32_0 : i32
    scf.if %2 {
      %cst_22 = arith.constant 0.000000e+00 : f32
      %35 = vector.broadcast %cst_22 : f32 to vector<1x128xf32>
      %c0_23 = arith.constant 0 : index
      %c0_24 = arith.constant 0 : index
      %36 = vector.load %arg8[%c0_23, %c0_24] : memref<1x128xf32, #tpu.memory_space<vmem>>, vector<1x128xf32>
      tpu.vector_store %arg8[%c0_23, %c0_24], %35 {strides = array<i32>} : memref<1x128xf32, #tpu.memory_space<vmem>>, vector<1x128xf32>,
    } else {
    }
    %c0 = arith.constant 0 : index
    %c0_1 = arith.constant 0 : index
    %c0_2 = arith.constant 0 : index
    %3 = vector.load %arg2[%c0, %c0_1, %c0_2] : memref<1x512x64xbf16, #tpu.memory_space<vmem>>, vector<1x512x64xbf16>
    %4 = vector.shape_cast %3 : vector<1x512x64xbf16> to vector<512x64xbf16>
    %c0_3 = arith.constant 0 : index
    %c0_4 = arith.constant 0 : index
    %5 = vector.load %arg3[%c0_3, %c0_4] : memref<64x64xbf16, #tpu.memory_space<vmem>>, vector<64x64xbf16>
    %cst = arith.constant dense<0.000000e+00> : vector<512x64xf32>
    %6 = tpu.matmul %4, %5, %cst {dimension_numbers = #tpu.dot_dimension_numbers<[1], [0], [0], [1], [0, 0, 1, 1], [], []>} : vector<512x64xbf16>, vector<64x64xbf16>, vector<512x64xf32> -> vector<512x64xf32>
    %cst_5 = arith.constant 5.000000e-01 : f32
    %7 = vector.broadcast %cst_5 : f32 to vector<512x64xf32>
    %8 = arith.mulf %7, %6 : vector<512x64xf32>
    %9 = math.tanh %8 : vector<512x64xf32>
    %cst_6 = arith.constant 5.000000e-01 : f32
    %10 = vector.broadcast %cst_6 : f32 to vector<512x64xf32>
    %11 = arith.mulf %10, %9 : vector<512x64xf32>
    %cst_7 = arith.constant 5.000000e-01 : f32
    %12 = vector.broadcast %cst_7 : f32 to vector<512x64xf32>
    %13 = arith.addf %11, %12 : vector<512x64xf32>
    %14 = arith.mulf %6, %13 : vector<512x64xf32>
    %15 = arith.truncf %14 : vector<512x64xf32> to vector<512x64xbf16>
    %c0_8 = arith.constant 0 : index
    %c0_9 = arith.constant 0 : index
    %16 = vector.load %arg4[%c0_8, %c0_9] : memref<64x128xbf16, #tpu.memory_space<vmem>>, vector<64x128xbf16>
    %cst_10 = arith.constant dense<0.000000e+00> : vector<512x128xf32>
    %17 = tpu.matmul %15, %16, %cst_10 {dimension_numbers = #tpu.dot_dimension_numbers<[1], [0], [0], [1], [0, 0, 1, 1], [], []>} : vector<512x64xbf16>, vector<64x128xbf16>, vector<512x128xf32> -> vector<512x128xf32>
    %cst_11 = arith.constant 5.000000e-01 : f32
    %18 = vector.broadcast %cst_11 : f32 to vector<512x128xf32>
    %19 = arith.mulf %18, %17 : vector<512x128xf32>
    %20 = math.tanh %19 : vector<512x128xf32>
    %cst_12 = arith.constant 5.000000e-01 : f32
    %21 = vector.broadcast %cst_12 : f32 to vector<512x128xf32>
    %22 = arith.mulf %21, %20 : vector<512x128xf32>
    %cst_13 = arith.constant 5.000000e-01 : f32
    %23 = vector.broadcast %cst_13 : f32 to vector<512x128xf32>
    %24 = arith.addf %22, %23 : vector<512x128xf32>
    %25 = arith.mulf %17, %24 : vector<512x128xf32>
    %26 = arith.truncf %25 : vector<512x128xf32> to vector<512x128xbf16>
    %cst_14 = arith.constant 1.000000e+00 : bf16
    %27 = vector.broadcast %cst_14 : bf16 to vector<1x512xbf16>
    %c0_15 = arith.constant 0 : index
    %c0_16 = arith.constant 0 : index
    %28 = vector.load %arg8[%c0_15, %c0_16] : memref<1x128xf32, #tpu.memory_space<vmem>>, vector<1x128xf32>
    %cst_17 = arith.constant dense<0.000000e+00> : vector<1x128xf32>
    %29 = tpu.matmul %27, %26, %cst_17 {dimension_numbers = #tpu.dot_dimension_numbers<[1], [0], [0], [1], [0, 0, 1, 1], [], []>} : vector<1x512xbf16>, vector<512x128xbf16>, vector<1x128xf32> -> vector<1x128xf32>
    %30 = arith.addf %28, %29 : vector<1x128xf32>
    %c0_18 = arith.constant 0 : index
    %c0_19 = arith.constant 0 : index
    %31 = vector.load %arg8[%c0_18, %c0_19] : memref<1x128xf32, #tpu.memory_space<vmem>>, vector<1x128xf32>
    tpu.vector_store %arg8[%c0_18, %c0_19], %30 {strides = array<i32>} : memref<1x128xf32, #tpu.memory_space<vmem>>, vector<1x128xf32>,
    %c0_i32_20 = arith.constant 0 : i32
    %32 = arith.cmpi eq, %arg1, %c0_i32_20 : i32
    %33 = arith.extui %32 : i1 to i32
    %c0_i32_21 = arith.constant 0 : i32
    %34 = arith.cmpi ne, %33, %c0_i32_21 : i32
    scf.if %34 {
      %c0_22 = arith.constant 0 : index
      %c0_23 = arith.constant 0 : index
      %35 = vector.load %arg8[%c0_22, %c0_23] : memref<1x128xf32, #tpu.memory_space<vmem>>, vector<1x128xf32>
      %cst_24 = arith.constant 0.00444444455 : f32
      %36 = vector.broadcast %cst_24 : f32 to vector<1x128xf32>
      %37 = arith.mulf %35, %36 : vector<1x128xf32>
      %38 = arith.truncf %37 : vector<1x128xf32> to vector<1x128xbf16>
      %c0_25 = arith.constant 0 : index
      %c0_26 = arith.constant 0 : index
      %39 = vector.load %arg5[%c0_25, %c0_26] : memref<128x256xbf16, #tpu.memory_space<vmem>>, vector<128x256xbf16>
      %cst_27 = arith.constant dense<0.000000e+00> : vector<1x256xf32>
      %40 = tpu.matmul %38, %39, %cst_27 {dimension_numbers = #tpu.dot_dimension_numbers<[1], [0], [0], [1], [0, 0, 1, 1], [], []>} : vector<1x128xbf16>, vector<128x256xbf16>, vector<1x256xf32> -> vector<1x256xf32>
      %c0_28 = arith.constant 0 : index
      %c0_29 = arith.constant 0 : index
      %41 = vector.load %arg6[%c0_28, %c0_29] : memref<1x256xf32, #tpu.memory_space<vmem>>, vector<1x256xf32>
      %42 = arith.addf %40, %41 : vector<1x256xf32>
      %c0_30 = arith.constant 0 : index
      %c0_31 = arith.constant 0 : index
      %c0_32 = arith.constant 0 : index
      %43 = vector.load %arg7[%c0_30, %c0_31, %c0_32] : memref<1x1x256xf32, #tpu.memory_space<vmem>>, vector<1x1x256xf32>
      %44 = vector.shape_cast %43 : vector<1x1x256xf32> to vector<1x256xf32>
      %45 = vector.shape_cast %42 : vector<1x256xf32> to vector<1x1x256xf32>
      tpu.vector_store %arg7[%c0_30, %c0_31, %c0_32], %45 {strides = array<i32>} : memref<1x1x256xf32, #tpu.memory_space<vmem>>, vector<1x1x256xf32>,
    } else {
    }
    return
  }
  func.func @transform_0(%arg0: i32, %arg1: i32) -> (i32, i32, i32) {
    %c0_i32 = arith.constant 0 : i32
    %c0_i32_0 = arith.constant 0 : i32
    return %arg0, %arg1, %c0_i32 : i32, i32, i32
  }
  func.func @transform_1(%arg0: i32, %arg1: i32) -> (i32, i32) {
    %c0_i32 = arith.constant 0 : i32
    %c0_i32_0 = arith.constant 0 : i32
    %c0_i32_1 = arith.constant 0 : i32
    return %c0_i32, %c0_i32_0 : i32, i32
  }
  func.func @transform_2(%arg0: i32, %arg1: i32) -> (i32, i32) {
    %c0_i32 = arith.constant 0 : i32
    %c0_i32_0 = arith.constant 0 : i32
    %c0_i32_1 = arith.constant 0 : i32
    return %c0_i32, %c0_i32_0 : i32, i32
  }
  func.func @transform_3(%arg0: i32, %arg1: i32) -> (i32, i32) {
    %c0_i32 = arith.constant 0 : i32
    %c0_i32_0 = arith.constant 0 : i32
    %c0_i32_1 = arith.constant 0 : i32
    return %c0_i32, %c0_i32_0 : i32, i32
  }
  func.func @transform_4(%arg0: i32, %arg1: i32) -> (i32, i32) {
    %c0_i32 = arith.constant 0 : i32
    %c0_i32_0 = arith.constant 0 : i32
    %c0_i32_1 = arith.constant 0 : i32
    return %c0_i32, %c0_i32_0 : i32, i32
  }
  func.func @transform_5(%arg0: i32, %arg1: i32) -> (i32, i32, i32) {
    %c0_i32 = arith.constant 0 : i32
    %c0_i32_0 = arith.constant 0 : i32
    %c0_i32_1 = arith.constant 0 : i32
    return %arg0, %c0_i32, %c0_i32_0 : i32, i32, i32
  }
}

</mosaic_0001>

<bundles_post_ra>
// kernel: forward.1
= control target key start
LH: loop header
LB: loop body
LE: loop exit
PB: predicated region body
PF: predicated region fallthrough
CT: control target
= control target key end

     0   :  { %s2749_s18 = smov 0   ;;  %s2751_s19 = smov 0   ;;  %s3335_s0 = inlined_call_operand.vmem [shape: bf16[2,512,64], index: 0, kind: input, shape index: {}]   ;;  %s3336_s1 = inlined_call_operand.vmem [shape: bf16[64,64], index: 1, kind: input, shape index: {}]   ;;  %s3337_s2 = inlined_call_operand.vmem [shape: bf16[64,128], index: 2, kind: input, shape index: {}]   ;;  %s3338_s3 = inlined_call_operand.vmem [shape: bf16[128,256], index: 3, kind: input, shape index: {}]   ;;  %s3339_s4 = inlined_call_operand.vmem [shape: f32[1,256], index: 4, kind: input, shape index: {}]   ;;  %s3340_s5 = inlined_call_operand.vmem [shape: f32[2,1,256], index: 5, kind: output, shape index: {}]  }
   0x1   :  { %s2753_s20 = smov 0  }
   0x2 LB: > { %s27_s21 = sadd.s32 1, %s2711_s19  ;;  %p2052_p0 = scmp.ge.s32.totalorder %s2715_s20, 1  ;;  %s2715_s20 = sphi %s2753_s20, %s15_s20   ;;  %s2711_s19 = sphi %s2751_s19, %s3343_s19   ;;  %s2707_s18 = sphi %s2749_s18, %s3342_s18  }
   0x3   : > { %p29_p1 = scmp.ge.s32.totalorder %s27_s21, 2  ;;  %p206_p2 = scmp.lt.s32.totalorder %s2715_s20, 3 }
   0x5   : > { %s3345_s21 = smov (%p29_p1, %s27_s21), 0  ;;  %p207_p3 = pnand %p2052_p0, %p206_p2 }
   0x6   : > { %p238_p4 = scmp.lt.s32.totalorder (!%p207_p3), %s2707_s18, 1 }
   0x7   : > { %210 = sbr.rel (%p207_p3) target bundleno = 921 (0x399), region = 40 }
   0xc   : > { %v2382_v0 = vld [vmem:[%s3336_s1 + $0x18] sm:$0xff]  ;;  %v2381_v1 = vld [vmem:[%s3336_s1 + $0x10] sm:$0xff]  ;;  %s3347_s18 = smov (!%p238_p4, %s2707_s18), 1  ;;  %v2380_v2 = vld [vmem:[%s3336_s1 + $0x8] sm:$0xff]  ;;  %vm514_vm0 = vcmask 523264   ;;  %vm1973_vm1 = vcmask 1040384  }
   0xd   : > { %615 = vmatpush.bf16.msra.mxu0 %v2382_v0  ;;  %2403 = vmatpush.bf16.msra.mxu2 %v2382_v0  ;;  %s2346_s28 = sshll.u32 %s3347_s18, 8  ;;  %v2379_v3 = vld [vmem:[%s3336_s1] sm:$0xff]  ;;  %v2386_v18 = vld [vmem:[%s3337_s2 + $0x18] sm:$0xff]  ;;  %v2385_v19 = vld [vmem:[%s3337_s2 + $0x10] sm:$0xff]  ;;  %s2055_s24 = sshll.u32 %s3347_s18, 1 }
   0xe   : > { %s2785_s8 = scalar_lea.vmem %s3335_s0, %s2346_s28  ;;  %1264 = vmatpush.bf16.msra.mxu1 %v2386_v18  ;;  %2407 = vmatpush.bf16.msra.mxu3 %v2386_v18  ;;  %v2384_v22 = vld [vmem:[%s3337_s2 + $0x8] sm:$0xff]  ;;  %v2383_v23 = vld [vmem:[%s3337_s2] sm:$0xff]  ;;  %s250_s27 = scalar_lea.vmem %s3340_s5, %s2055_s24 }
   0xf   : > { %v2347_v4 = vld [vmem:[%s2785_s8] sm:$0xff]  ;;  %v2366_v5 = vld [vmem:[%s2785_s8 + $0x98] sm:$0xff]  ;;  %v2348_v6 = vld [vmem:[%s2785_s8 + $0x8] sm:$0xff] }
  0x10   : > { %v2367_v7 = vld [vmem:[%s2785_s8 + $0xa0] sm:$0xff]  ;;  %v2349_v8 = vld [vmem:[%s2785_s8 + $0x10] sm:$0xff]  ;;  %v2368_v9 = vld [vmem:[%s2785_s8 + $0xa8] sm:$0xff] }
  0x11   : > { %616 = vmatpush.bf16.msra.mxu0 %v2381_v1  ;;  %2404 = vmatpush.bf16.msra.mxu2 %v2381_v1  ;;  %v2350_v10 = vld [vmem:[%s2785_s8 + $0x18] sm:$0xff]  ;;  %v2369_v11 = vld [vmem:[%s2785_s8 + $0xb0] sm:$0xff]  ;;  %v2351_v12 = vld [vmem:[%s2785_s8 + $0x20] sm:$0xff] }
  0x12   : > { %v2370_v13 = vld [vmem:[%s2785_s8 + $0xb8] sm:$0xff]  ;;  %v2352_v14 = vld [vmem:[%s2785_s8 + $0x28] sm:$0xff]  ;;  %v2371_v15 = vld [vmem:[%s2785_s8 + $0xc0] sm:$0xff]  ;;  %1265 = vmatpush.bf16.msra.mxu1 %v2385_v19  ;;  %2408 = vmatpush.bf16.msra.mxu3 %v2385_v19 }
  0x13   : > { %v2353_v16 = vld [vmem:[%s2785_s8 + $0x30] sm:$0xff]  ;;  %v2372_v17 = vld [vmem:[%s2785_s8 + $0xc8] sm:$0xff]  ;;  %v2354_v20 = vld [vmem:[%s2785_s8 + $0x38] sm:$0xff] }
  0x14   : > { %v2373_v21 = vld [vmem:[%s2785_s8 + $0xd0] sm:$0xff]  ;;  %v2355_v24 = vld [vmem:[%s2785_s8 + $0x40] sm:$0xff]  ;;  %v2374_v26 = vld [vmem:[%s2785_s8 + $0xd8] sm:$0xff] }
  0x15   : > { %617 = vmatpush.bf16.msra.mxu0 %v2380_v2  ;;  %2405 = vmatpush.bf16.msra.mxu2 %v2380_v2  ;;  %v2356_v36 = vld [vmem:[%s2785_s8 + $0x48] sm:$0xff]  ;;  %v2375_v39 = vld [vmem:[%s2785_s8 + $0xe0] sm:$0xff]  ;;  %v2357_v0 = vld [vmem:[%s2785_s8 + $0x50] sm:$0xff] }
  0x16   : > { %1266 = vmatpush.bf16.msra.mxu1 %v2384_v22  ;;  %2409 = vmatpush.bf16.msra.mxu3 %v2384_v22 }
  0x19   : > { %618 = vmatpush.bf16.msra.mxu0 %v2379_v3  ;;  %2406 = vmatpush.bf16.msra.mxu2 %v2379_v3  ;;  %v2376_v3 = vld [vmem:[%s2785_s8 + $0xe8] sm:$0xff] }
  0x1a   : > { %1267 = vmatpush.bf16.msra.mxu1 %v2383_v23  ;;  %2410 = vmatpush.bf16.msra.mxu3 %v2383_v23 }
  0x1c   : > { %2200 = vmatmul.msk.bf16.vlgmr.msra.gmra.mxu0 %vm514_vm0, %v2347_v4  ;;  %2219 = vmatmul.msk.bf16.vlgmr.msra.gmra.mxu2 %vm514_vm0, %v2366_v5 }
  0x2c   : > { %2201 = vmatmul.msk.bf16.gmra.mxu0 %vm514_vm0, %v2348_v6  ;;  %2220 = vmatmul.msk.bf16.gmra.mxu2 %vm514_vm0, %v2367_v7 }
  0x3c   : > { %2202 = vmatmul.msk.bf16.gmra.mxu0 %vm514_vm0, %v2349_v8  ;;  %2221 = vmatmul.msk.bf16.gmra.mxu2 %vm514_vm0, %v2368_v9 }
  0x4c   : > { %2203 = vmatmul.msk.bf16.gmra.mxu0 %vm514_vm0, %v2350_v10  ;;  %2222 = vmatmul.msk.bf16.gmra.mxu2 %vm514_vm0, %v2369_v11 }
  0x5c   : > { %2204 = vmatmul.msk.bf16.gmra.mxu0 %vm514_vm0, %v2351_v12  ;;  %2223 = vmatmul.msk.bf16.gmra.mxu2 %vm514_vm0, %v2370_v13 }
  0x6c   : > { %2205 = vmatmul.msk.bf16.gmra.mxu0 %vm514_vm0, %v2352_v14  ;;  %2224 = vmatmul.msk.bf16.gmra.mxu2 %vm514_vm0, %v2371_v15 }
  0x7c   : > { %2206 = vmatmul.msk.bf16.gmra.mxu0 %vm514_vm0, %v2353_v16  ;;  %2225 = vmatmul.msk.bf16.gmra.mxu2 %vm514_vm0, %v2372_v17 }
  0x8c   : > { %2207 = vmatmul.msk.bf16.gmra.mxu0 %vm514_vm0, %v2354_v20  ;;  %2226 = vmatmul.msk.bf16.gmra.mxu2 %vm514_vm0, %v2373_v21 }
  0x99   : > { %v620_v25 = vpop.f32.mrf.mxu0 }
  0x9a   : > { %v780_v27 = vmul.f32 0.5, %v620_v25 }
  0x9c   : > { %2208 = vmatmul.msk.bf16.gmra.mxu0 %vm514_vm0, %v2355_v24  ;;  %2227 = vmatmul.msk.bf16.gmra.mxu2 %vm514_vm0, %v2374_v26  ;;  %2437 = vtanh.f32 %v780_v27 }
  0x9f   : > { %v715_v28 = vpop.f32.mrf.mxu2 }
  0xa0   : > { %v818_v29 = vmul.f32 0.5, %v715_v28 }
  0xa1   : > { %v622_v30 = vpop.f32.mrf.mxu0 }
  0xa2   : > { %v781_v31 = vmul.f32 0.5, %v622_v30  ;;  %2439 = vtanh.f32 %v818_v29  ;;  %v2438_v32 = vpop.eup %2437 }
  0xa3   : > { %v908_v33 = vmul.f32 0.5, %v2438_v32 }
  0xa4   : > { %2441 = vtanh.f32 %v781_v31  ;;  %v2377_v31 = vld [vmem:[%s2785_s8 + $0xf0] sm:$0xff] }
  0xa5   : > { %v972_v42 = vadd.f32 0.5, %v908_v33 }
  0xa7   : > { %v717_v34 = vpop.f32.mrf.mxu2  ;;  %v1036_v46 = vmul.f32 %v972_v42, %v620_v25 }
  0xa8   : > { %v2440_v35 = vpop.eup %2439  ;;  %v819_v37 = vmul.f32 0.5, %v717_v34 }
  0xa9   : > { %v625_v38 = vpop.f32.mrf.mxu0  ;;  %v946_v44 = vmul.f32 0.5, %v2440_v35 }
  0xaa   : > { %v2442_v40 = vpop.eup %2441  ;;  %v782_v41 = vmul.f32 0.5, %v625_v38  ;;  %2443 = vtanh.f32 %v819_v37 }
  0xab   : > { %v909_v43 = vmul.f32 0.5, %v2442_v40  ;;  %v1010_v48 = vadd.f32 0.5, %v946_v44 }
  0xac   : > { %2209 = vmatmul.msk.bf16.gmra.mxu0 %vm514_vm0, %v2356_v36  ;;  %2228 = vmatmul.msk.bf16.gmra.mxu2 %vm514_vm0, %v2375_v39  ;;  %2445 = vtanh.f32 %v782_v41 }
  0xad   : > { %v973_v45 = vadd.f32 0.5, %v909_v43  ;;  %v1074_v56 = vmul.f32 %v1010_v48, %v715_v28  ;;  %v2358_v28 = vld [vmem:[%s2785_s8 + $0x58] sm:$0xff] }
  0xaf   : > { %v1037_v47 = vmul.f32 %v973_v45, %v622_v30  ;;  %v720_v49 = vpop.f32.mrf.mxu2 }
  0xb0   : > { %v2444_v50 = vpop.eup %2443  ;;  %v820_v51 = vmul.f32 0.5, %v720_v49 }
  0xb1   : > { %v627_v52 = vpop.f32.mrf.mxu0  ;;  %v1100_v53 = vpack.c.bf16 %v1037_v47, %v1036_v46  ;;  %v947_v54 = vmul.f32 0.5, %v2444_v50 }
  0xb2   : > { %v783_v55 = vmul.f32 0.5, %v627_v52  ;;  %2447 = vtanh.f32 %v820_v51  ;;  %v2446_v58 = vpop.eup %2445 }
  0xb3   : > { %2248 = vmatmul.msk.bf16.vlgmr.msra.gmra.mxu1 %vm514_vm0, %v1100_v53  ;;  %v1011_v57 = vadd.f32 0.5, %v947_v54  ;;  %v910_v60 = vmul.f32 0.5, %v2446_v58 }
  0xb4   : > { %2449 = vtanh.f32 %v783_v55 }
  0xb5   : > { %v1075_v59 = vmul.f32 %v1011_v57, %v717_v34  ;;  %v974_v6 = vadd.f32 0.5, %v910_v60 }
  0xb7   : > { %v722_v61 = vpop.f32.mrf.mxu2  ;;  %v1119_v62 = vpack.c.bf16 %v1075_v59, %v1074_v56  ;;  %v1038_v10 = vmul.f32 %v974_v6, %v625_v38  ;;  %v2359_v56 = vld [vmem:[%s2785_s8 + $0x60] sm:$0xff]  ;;  %v2378_v59 = vld [vmem:[%s2785_s8 + $0xf8] sm:$0xff] }
  0xb8   : > { %v2448_v63 = vpop.eup %2447  ;;  %v821_v1 = vmul.f32 0.5, %v722_v61 }
  0xb9   : > { %v630_v2 = vpop.f32.mrf.mxu0  ;;  %2267 = vmatmul.msk.bf16.vlgmr.msra.gmra.mxu3 %vm514_vm0, %v1119_v62  ;;  %v948_v8 = vmul.f32 0.5, %v2448_v63 }
  0xba   : > { %v2450_v4 = vpop.eup %2449  ;;  %v784_v5 = vmul.f32 0.5, %v630_v2  ;;  %2451 = vtanh.f32 %v821_v1 }
  0xbb   : > { %v911_v7 = vmul.f32 0.5, %v2450_v4  ;;  %v1012_v12 = vadd.f32 0.5, %v948_v8 }
  0xbc   : > { %2210 = vmatmul.msk.bf16.gmra.mxu0 %vm514_vm0, %v2357_v0  ;;  %2229 = vmatmul.msk.bf16.gmra.mxu2 %vm514_vm0, %v2376_v3  ;;  %2453 = vtanh.f32 %v784_v5 }
  0xbd   : > { %v975_v9 = vadd.f32 0.5, %v911_v7  ;;  %v1076_v20 = vmul.f32 %v1012_v12, %v720_v49 }
  0xbf   : > { %v1039_v11 = vmul.f32 %v975_v9, %v627_v52  ;;  %v725_v13 = vpop.f32.mrf.mxu2 }
  0xc0   : > { %v2452_v14 = vpop.eup %2451  ;;  %v822_v15 = vmul.f32 0.5, %v725_v13 }
  0xc1   : > { %v632_v16 = vpop.f32.mrf.mxu0  ;;  %v1101_v17 = vpack.c.bf16 %v1039_v11, %v1038_v10  ;;  %v949_v18 = vmul.f32 0.5, %v2452_v14 }
  0xc2   : > { %v785_v19 = vmul.f32 0.5, %v632_v16  ;;  %2455 = vtanh.f32 %v822_v15  ;;  %v2454_v22 = vpop.eup %2453 }
  0xc3   : > { %2249 = vmatmul.msk.bf16.gmra.mxu1 %vm514_vm0, %v1101_v17  ;;  %v1013_v21 = vadd.f32 0.5, %v949_v18  ;;  %v912_v24 = vmul.f32 0.5, %v2454_v22 }
  0xc4   : > { %2457 = vtanh.f32 %v785_v19 }
  0xc5   : > { %v1077_v23 = vmul.f32 %v1013_v21, %v722_v61  ;;  %v976_v34 = vadd.f32 0.5, %v912_v24 }
  0xc7   : > { %v727_v25 = vpop.f32.mrf.mxu2  ;;  %v1120_v26 = vpack.c.bf16 %v1077_v23, %v1076_v20  ;;  %v1040_v38 = vmul.f32 %v976_v34, %v630_v2  ;;  %v2360_v20 = vld [vmem:[%s2785_s8 + $0x68] sm:$0xff] }
  0xc8   : > { %v2456_v27 = vpop.eup %2455  ;;  %v823_v29 = vmul.f32 0.5, %v727_v25 }
  0xc9   : > { %v635_v30 = vpop.f32.mrf.mxu0  ;;  %2268 = vmatmul.msk.bf16.gmra.mxu3 %vm514_vm0, %v1120_v26  ;;  %v950_v36 = vmul.f32 0.5, %v2456_v27 }
  0xca   : > { %v2458_v32 = vpop.eup %2457  ;;  %v786_v33 = vmul.f32 0.5, %v635_v30  ;;  %2459 = vtanh.f32 %v823_v29 }
  0xcb   : > { %v913_v35 = vmul.f32 0.5, %v2458_v32  ;;  %v1014_v40 = vadd.f32 0.5, %v950_v36 }
  0xcc   : > { %2211 = vmatmul.msk.bf16.gmra.mxu0 %vm514_vm0, %v2358_v28  ;;  %2230 = vmatmul.msk.bf16.gmra.mxu2 %vm514_vm0, %v2377_v31  ;;  %2461 = vtanh.f32 %v786_v33 }
  0xcd   : > { %v977_v37 = vadd.f32 0.5, %v913_v35  ;;  %v1078_v48 = vmul.f32 %v1014_v40, %v725_v13 }
  0xcf   : > { %v1041_v39 = vmul.f32 %v977_v37, %v632_v16  ;;  %v730_v41 = vpop.f32.mrf.mxu2 }
  0xd0   : > { %v2460_v42 = vpop.eup %2459  ;;  %v824_v43 = vmul.f32 0.5, %v730_v41 }
  0xd1   : > { %v637_v44 = vpop.f32.mrf.mxu0  ;;  %v1102_v45 = vpack.c.bf16 %v1041_v39, %v1040_v38  ;;  %v951_v46 = vmul.f32 0.5, %v2460_v42 }
  0xd2   : > { %v787_v47 = vmul.f32 0.5, %v637_v44  ;;  %2463 = vtanh.f32 %v824_v43  ;;  %v2462_v50 = vpop.eup %2461 }
  0xd3   : > { %2250 = vmatmul.msk.bf16.gmra.mxu1 %vm514_vm0, %v1102_v45  ;;  %v1015_v49 = vadd.f32 0.5, %v951_v46  ;;  %v914_v52 = vmul.f32 0.5, %v2462_v50 }
  0xd4   : > { %2465 = vtanh.f32 %v787_v47  ;;  %v2361_v47 = vld [vmem:[%s2785_s8 + $0x70] sm:$0xff] }
  0xd5   : > { %v1079_v51 = vmul.f32 %v1015_v49, %v727_v25  ;;  %v978_v62 = vadd.f32 0.5, %v914_v52 }
  0xd7   : > { %v732_v53 = vpop.f32.mrf.mxu2  ;;  %v1121_v54 = vpack.c.bf16 %v1079_v51, %v1078_v48  ;;  %v1042_v2 = vmul.f32 %v978_v62, %v635_v30 }
  0xd8   : > { %v2464_v55 = vpop.eup %2463  ;;  %v825_v57 = vmul.f32 0.5, %v732_v53 }
  0xd9   : > { %v640_v58 = vpop.f32.mrf.mxu0  ;;  %2269 = vmatmul.msk.bf16.gmra.mxu3 %vm514_vm0, %v1121_v54  ;;  %v952_v0 = vmul.f32 0.5, %v2464_v55 }
  0xda   : > { %v2466_v60 = vpop.eup %2465  ;;  %v788_v61 = vmul.f32 0.5, %v640_v58  ;;  %2467 = vtanh.f32 %v825_v57 }
  0xdb   : > { %v915_v63 = vmul.f32 0.5, %v2466_v60  ;;  %v1016_v4 = vadd.f32 0.5, %v952_v0 }
  0xdc   : > { %2212 = vmatmul.msk.bf16.gmra.mxu0 %vm514_vm0, %v2359_v56  ;;  %2231 = vmatmul.msk.bf16.gmra.mxu2 %vm514_vm0, %v2378_v59  ;;  %2469 = vtanh.f32 %v788_v61 }
  0xdd   : > { %v979_v1 = vadd.f32 0.5, %v915_v63  ;;  %v1080_v12 = vmul.f32 %v1016_v4, %v730_v41 }
  0xdf   : > { %v1043_v3 = vmul.f32 %v979_v1, %v637_v44  ;;  %v735_v5 = vpop.f32.mrf.mxu2 }
  0xe0   : > { %v2468_v6 = vpop.eup %2467  ;;  %v826_v7 = vmul.f32 0.5, %v735_v5 }
  0xe1   : > { %v642_v8 = vpop.f32.mrf.mxu0  ;;  %v1103_v9 = vpack.c.bf16 %v1043_v3, %v1042_v2  ;;  %v953_v10 = vmul.f32 0.5, %v2468_v6 }
  0xe2   : > { %v789_v11 = vmul.f32 0.5, %v642_v8  ;;  %2471 = vtanh.f32 %v826_v7  ;;  %v2470_v14 = vpop.eup %2469 }
  0xe3   : > { %2251 = vmatmul.msk.bf16.gmra.mxu1 %vm514_vm0, %v1103_v9  ;;  %v1017_v13 = vadd.f32 0.5, %v953_v10  ;;  %v916_v16 = vmul.f32 0.5, %v2470_v14  ;;  %v2362_v10 = vld [vmem:[%s2785_s8 + $0x78] sm:$0xff] }
  0xe4   : > { %2473 = vtanh.f32 %v789_v11 }
  0xe5   : > { %v1081_v15 = vmul.f32 %v1017_v13, %v732_v53  ;;  %v980_v25 = vadd.f32 0.5, %v916_v16 }
  0xe7   : > { %v737_v17 = vpop.f32.mrf.mxu2  ;;  %v1122_v18 = vpack.c.bf16 %v1081_v15, %v1080_v12  ;;  %v1044_v29 = vmul.f32 %v980_v25, %v640_v58 }
  0xe8   : > { %v2472_v19 = vpop.eup %2471  ;;  %v827_v21 = vmul.f32 0.5, %v737_v17 }
  0xe9   : > { %v645_v22 = vpop.f32.mrf.mxu0  ;;  %2270 = vmatmul.msk.bf16.gmra.mxu3 %vm514_vm0, %v1122_v18  ;;  %v954_v27 = vmul.f32 0.5, %v2472_v19 }
  0xea   : > { %v2474_v23 = vpop.eup %2473  ;;  %v790_v24 = vmul.f32 0.5, %v645_v22  ;;  %2475 = vtanh.f32 %v827_v21 }
  0xeb   : > { %v917_v26 = vmul.f32 0.5, %v2474_v23  ;;  %v1018_v31 = vadd.f32 0.5, %v954_v27 }
  0xec   : > { %2213 = vmatmul.msk.bf16.gmra.mxu0 %vm514_vm0, %v2360_v20  ;;  %2477 = vtanh.f32 %v790_v24 }
  0xed   : > { %v981_v28 = vadd.f32 0.5, %v917_v26  ;;  %v1082_v39 = vmul.f32 %v1018_v31, %v735_v5 }
  0xef   : > { %v1045_v30 = vmul.f32 %v981_v28, %v642_v8  ;;  %v740_v32 = vpop.f32.mrf.mxu2 }
  0xf0   : > { %v2476_v33 = vpop.eup %2475  ;;  %v828_v34 = vmul.f32 0.5, %v740_v32 }
  0xf1   : > { %v647_v35 = vpop.f32.mrf.mxu0  ;;  %v1104_v36 = vpack.c.bf16 %v1045_v30, %v1044_v29  ;;  %v955_v37 = vmul.f32 0.5, %v2476_v33 }
  0xf2   : > { %v791_v38 = vmul.f32 0.5, %v647_v35  ;;  %2479 = vtanh.f32 %v828_v34  ;;  %v2478_v41 = vpop.eup %2477 }
  0xf3   : > { %2252 = vmatmul.msk.bf16.gmra.mxu1 %vm514_vm0, %v1104_v36  ;;  %v1019_v40 = vadd.f32 0.5, %v955_v37  ;;  %v918_v43 = vmul.f32 0.5, %v2478_v41  ;;  %v2363_v36 = vld [vmem:[%s2785_s8 + $0x80] sm:$0xff] }
  0xf4   : > { %2481 = vtanh.f32 %v791_v38 }
  0xf5   : > { %v1083_v42 = vmul.f32 %v1019_v40, %v737_v17  ;;  %v982_v52 = vadd.f32 0.5, %v918_v43 }
  0xf7   : > { %v1123_v44 = vpack.c.bf16 %v1083_v42, %v1082_v39  ;;  %v742_v45 = vpop.f32.mrf.mxu2  ;;  %v1046_v56 = vmul.f32 %v982_v52, %v645_v22 }
  0xf8   : > { %v2480_v46 = vpop.eup %2479  ;;  %v829_v48 = vmul.f32 0.5, %v742_v45 }
  0xf9   : > { %v650_v49 = vpop.f32.mrf.mxu0  ;;  %2271 = vmatmul.msk.bf16.gmra.mxu3 %vm514_vm0, %v1123_v44  ;;  %v956_v54 = vmul.f32 0.5, %v2480_v46 }
  0xfa   : > { %v2482_v50 = vpop.eup %2481  ;;  %v792_v51 = vmul.f32 0.5, %v650_v49  ;;  %2483 = vtanh.f32 %v829_v48 }
  0xfb   : > { %v919_v53 = vmul.f32 0.5, %v2482_v50  ;;  %v1020_v58 = vadd.f32 0.5, %v956_v54 }
  0xfc   : > { %2214 = vmatmul.msk.bf16.gmra.mxu0 %vm514_vm0, %v2361_v47  ;;  %2485 = vtanh.f32 %v792_v51 }
  0xfd   : > { %v983_v55 = vadd.f32 0.5, %v919_v53  ;;  %v1084_v2 = vmul.f32 %v1020_v58, %v740_v32 }
  0xff   : > { %v1047_v57 = vmul.f32 %v983_v55, %v647_v35  ;;  %v745_v59 = vpop.f32.mrf.mxu2 }
 0x100   : > { %v2484_v60 = vpop.eup %2483  ;;  %v830_v61 = vmul.f32 0.5, %v745_v59 }
 0x101   : > { %v652_v62 = vpop.f32.mrf.mxu0  ;;  %v1105_v63 = vpack.c.bf16 %v1047_v57, %v1046_v56  ;;  %v957_v0 = vmul.f32 0.5, %v2484_v60 }
 0x102   : > { %v793_v1 = vmul.f32 0.5, %v652_v62  ;;  %2487 = vtanh.f32 %v830_v61  ;;  %v2486_v4 = vpop.eup %2485 }
 0x103   : > { %2253 = vmatmul.msk.bf16.gmra.mxu1 %vm514_vm0, %v1105_v63  ;;  %v1021_v3 = vadd.f32 0.5, %v957_v0  ;;  %v920_v6 = vmul.f32 0.5, %v2486_v4  ;;  %v2364_v63 = vld [vmem:[%s2785_s8 + $0x88] sm:$0xff] }
 0x104   : > { %2489 = vtanh.f32 %v793_v1 }
 0x105   : > { %v1085_v5 = vmul.f32 %v1021_v3, %v742_v45  ;;  %v984_v15 = vadd.f32 0.5, %v920_v6 }
 0x107   : > { %v1124_v7 = vpack.c.bf16 %v1085_v5, %v1084_v2  ;;  %v747_v8 = vpop.f32.mrf.mxu2  ;;  %v1048_v19 = vmul.f32 %v984_v15, %v650_v49 }
 0x108   : > { %v2488_v9 = vpop.eup %2487  ;;  %v831_v11 = vmul.f32 0.5, %v747_v8 }
 0x109   : > { %v655_v12 = vpop.f32.mrf.mxu0  ;;  %2272 = vmatmul.msk.bf16.gmra.mxu3 %vm514_vm0, %v1124_v7  ;;  %v958_v17 = vmul.f32 0.5, %v2488_v9 }
 0x10a   : > { %v2490_v13 = vpop.eup %2489  ;;  %v794_v14 = vmul.f32 0.5, %v655_v12  ;;  %2491 = vtanh.f32 %v831_v11 }
 0x10b   : > { %v921_v16 = vmul.f32 0.5, %v2490_v13  ;;  %v1022_v21 = vadd.f32 0.5, %v958_v17 }
 0x10c   : > { %2215 = vmatmul.msk.bf16.gmra.mxu0 %vm514_vm0, %v2362_v10  ;;  %2493 = vtanh.f32 %v794_v14 }
 0x10d   : > { %v985_v18 = vadd.f32 0.5, %v921_v16  ;;  %v1086_v29 = vmul.f32 %v1022_v21, %v745_v59 }
 0x10f   : > { %v1049_v20 = vmul.f32 %v985_v18, %v652_v62  ;;  %v750_v23 = vpop.f32.mrf.mxu2 }
 0x110   : > { %v2492_v22 = vpop.eup %2491  ;;  %v832_v27 = vmul.f32 0.5, %v750_v23 }
 0x111   : > { %v657_v24 = vpop.f32.mrf.mxu0  ;;  %v1106_v25 = vpack.c.bf16 %v1049_v20, %v1048_v19  ;;  %v959_v26 = vmul.f32 0.5, %v2492_v22 }
 0x112   : > { %v795_v28 = vmul.f32 0.5, %v657_v24  ;;  %2495 = vtanh.f32 %v832_v27  ;;  %v2494_v31 = vpop.eup %2493 }
 0x113   : > { %2254 = vmatmul.msk.bf16.gmra.mxu1 %vm514_vm0, %v1106_v25  ;;  %v1023_v30 = vadd.f32 0.5, %v959_v26  ;;  %v922_v33 = vmul.f32 0.5, %v2494_v31 }
 0x114   : > { %2497 = vtanh.f32 %v795_v28 }
 0x115   : > { %v1087_v32 = vmul.f32 %v1023_v30, %v747_v8  ;;  %v986_v42 = vadd.f32 0.5, %v922_v33 }
 0x117   : > { %v1125_v34 = vpack.c.bf16 %v1087_v32, %v1086_v29  ;;  %v752_v35 = vpop.f32.mrf.mxu2  ;;  %v1050_v46 = vmul.f32 %v986_v42, %v655_v12  ;;  %v2365_v29 = vld [vmem:[%s2785_s8 + $0x90] sm:$0xff] }
 0x118   : > { %v2496_v37 = vpop.eup %2495  ;;  %v833_v39 = vmul.f32 0.5, %v752_v35 }
 0x119   : > { %v660_v38 = vpop.f32.mrf.mxu0  ;;  %2273 = vmatmul.msk.bf16.gmra.mxu3 %vm514_vm0, %v1125_v34  ;;  %v960_v44 = vmul.f32 0.5, %v2496_v37 }
 0x11a   : > { %v2498_v40 = vpop.eup %2497  ;;  %v796_v41 = vmul.f32 0.5, %v660_v38  ;;  %2499 = vtanh.f32 %v833_v39 }
 0x11b   : > { %v923_v43 = vmul.f32 0.5, %v2498_v40  ;;  %v1024_v48 = vadd.f32 0.5, %v960_v44 }
 0x11c   : > { %2216 = vmatmul.msk.bf16.gmra.mxu0 %vm514_vm0, %v2363_v36  ;;  %2501 = vtanh.f32 %v796_v41 }
 0x11d   : > { %v987_v45 = vadd.f32 0.5, %v923_v43  ;;  %v1088_v57 = vmul.f32 %v1024_v48, %v750_v23 }
 0x11f   : > { %v1051_v47 = vmul.f32 %v987_v45, %v657_v24  ;;  %v755_v49 = vpop.f32.mrf.mxu2 }
 0x120   : > { %v2500_v50 = vpop.eup %2499  ;;  %v834_v53 = vmul.f32 0.5, %v755_v49 }
 0x121   : > { %v1107_v51 = vpack.c.bf16 %v1051_v47, %v1050_v46  ;;  %v662_v52 = vpop.f32.mrf.mxu0  ;;  %v961_v55 = vmul.f32 0.5, %v2500_v50 }
 0x122   : > { %v797_v54 = vmul.f32 0.5, %v662_v52  ;;  %2503 = vtanh.f32 %v834_v53  ;;  %v2502_v56 = vpop.eup %2501 }
 0x123   : > { %2255 = vmatmul.msk.bf16.gmra.mxu1 %vm514_vm0, %v1107_v51  ;;  %v1025_v58 = vadd.f32 0.5, %v961_v55  ;;  %v924_v60 = vmul.f32 0.5, %v2502_v56 }
 0x124   : > { %2505 = vtanh.f32 %v797_v54 }
 0x125   : > { %v1089_v59 = vmul.f32 %v1025_v58, %v752_v35  ;;  %v988_v5 = vadd.f32 0.5, %v924_v60 }
 0x127   : > { %v1126_v61 = vpack.c.bf16 %v1089_v59, %v1088_v57  ;;  %v757_v62 = vpop.f32.mrf.mxu2  ;;  %v1052_v9 = vmul.f32 %v988_v5, %v660_v38 }
 0x128   : > { %v2504_v0 = vpop.eup %2503  ;;  %v835_v2 = vmul.f32 0.5, %v757_v62 }
 0x129   : > { %v665_v1 = vpop.f32.mrf.mxu0  ;;  %2274 = vmatmul.msk.bf16.gmra.mxu3 %vm514_vm0, %v1126_v61  ;;  %v962_v7 = vmul.f32 0.5, %v2504_v0 }
 0x12a   : > { %v2506_v3 = vpop.eup %2505  ;;  %v798_v4 = vmul.f32 0.5, %v665_v1  ;;  %2507 = vtanh.f32 %v835_v2 }
 0x12b   : > { %v925_v6 = vmul.f32 0.5, %v2506_v3  ;;  %v1026_v12 = vadd.f32 0.5, %v962_v7 }
 0x12c   : > { %2217 = vmatmul.msk.bf16.gmra.mxu0 %vm514_vm0, %v2364_v63  ;;  %2509 = vtanh.f32 %v798_v4 }
 0x12d   : > { %v989_v8 = vadd.f32 0.5, %v925_v6  ;;  %v1090_v22 = vmul.f32 %v1026_v12, %v755_v49 }
 0x12f   : > { %v1053_v10 = vmul.f32 %v989_v8, %v662_v52  ;;  %v2879_v13 = vpop.f32.mrf.mxu2 }
 0x130   : > { %v2877_v11 = vpop.f32.mrf.mxu1  ;;  %v2508_v14 = vpop.eup %2507  ;;  %v836_v18 = vmul.f32 0.5, %v2879_v13 }
 0x131   : > { %v1108_v15 = vpack.c.bf16 %v1053_v10, %v1052_v9  ;;  %v1429_v16 = vmul.f32 0.5, %v2877_v11  ;;  %v667_v17 = vpop.f32.mrf.mxu0  ;;  %v963_v20 = vmul.f32 0.5, %v2508_v14 }
 0x132   : > { %v799_v19 = vmul.f32 0.5, %v667_v17  ;;  %v2510_v21 = vpop.eup %2509 }
 0x133   : > { %2511 = vtanh.f32 %v1429_v16  ;;  %2256 = vmatmul.msk.bf16.gmra.mxu1 %vm514_vm0, %v1108_v15  ;;  %v1027_v23 = vadd.f32 0.5, %v963_v20  ;;  %v926_v25 = vmul.f32 0.5, %v2510_v21 }
 0x134   : > { %2513 = vtanh.f32 %v799_v19 }
 0x135   : > { %2515 = vtanh.f32 %v836_v18  ;;  %v1091_v24 = vmul.f32 %v1027_v23, %v757_v62  ;;  %v990_v37 = vadd.f32 0.5, %v926_v25 }
 0x137   : > { %v1127_v27 = vpack.c.bf16 %v1091_v24, %v1090_v22  ;;  %v762_v28 = vpop.f32.mrf.mxu2  ;;  %v1054_v44 = vmul.f32 %v990_v37, %v665_v1 }
 0x138   : > { %v1271_v26 = vpop.f32.mrf.mxu1  ;;  %v837_v33 = vmul.f32 0.5, %v762_v28 }
 0x139   : > { %v2512_v30 = vpop.eup %2511  ;;  %v1430_v31 = vmul.f32 0.5, %v1271_v26  ;;  %v2885_v32 = vpop.f32.mrf.mxu0  ;;  %2275 = vmatmul.msk.bf16.gmra.mxu3 %vm514_vm0, %v1127_v27 }
 0x13a   : > { %v2514_v34 = vpop.eup %2513  ;;  %v800_v35 = vmul.f32 0.5, %v2885_v32  ;;  %v1557_v42 = vmul.f32 0.5, %v2512_v30 }
 0x13b   : > { %v2516_v36 = vpop.eup %2515  ;;  %v927_v38 = vmul.f32 0.5, %v2514_v34  ;;  %2517 = vtanh.f32 %v1430_v31 }
 0x13c   : > { %v2889_v39 = vpop.f32.mrf.mxu3  ;;  %2218 = vmatmul.msk.bf16.gmra.mxu0 %vm514_vm0, %v2365_v29  ;;  %2519 = vtanh.f32 %v837_v33  ;;  %v964_v43 = vmul.f32 0.5, %v2516_v36  ;;  %v1621_v53 = vadd.f32 0.5, %v1557_v42 }
 0x13d   : > { %v991_v40 = vadd.f32 0.5, %v927_v38  ;;  %v1467_v41 = vmul.f32 0.5, %v2889_v39  ;;  %2521 = vtanh.f32 %v800_v35 }
 0x13e   : > { %v1028_v56 = vadd.f32 0.5, %v964_v43  ;;  %v2901_v0 = vmul.f32 %v1621_v53, %v2877_v11 }
 0x13f   : > { %v1055_v45 = vmul.f32 %v991_v40, %v667_v17  ;;  %2523 = vtanh.f32 %v1467_v41  ;;  %v2895_v47 = vpop.f32.mrf.mxu2 }
 0x140   : > { %v2893_v46 = vpop.f32.mrf.mxu1  ;;  %v838_v52 = vmul.f32 0.5, %v2895_v47  ;;  %v1092_v1 = vmul.f32 %v1028_v56, %v2879_v13 }
 0x141   : > { %v2518_v48 = vpop.eup %2517  ;;  %v1109_v49 = vpack.c.bf16 %v1055_v45, %v1054_v44  ;;  %v1431_v50 = vmul.f32 0.5, %v2893_v46  ;;  %v672_v51 = vpop.f32.mrf.mxu0 }
 0x142   : > { %v1558_v54 = vmul.f32 0.5, %v2518_v48  ;;  %v801_v55 = vmul.f32 0.5, %v672_v51  ;;  %v2520_v57 = vpop.eup %2519 }
 0x143   : > { %2525 = vtanh.f32 %v1431_v50  ;;  %2257 = vmatmul.msk.bf16.gmra.mxu1 %vm514_vm0, %v1109_v49  ;;  %v2522_v58 = vpop.eup %2521  ;;  %v965_v59 = vmul.f32 0.5, %v2520_v57 }
 0x144   : > { %2527 = vtanh.f32 %v801_v55  ;;  %v1366_v60 = vpop.f32.mrf.mxu3  ;;  %v1622_v61 = vadd.f32 0.5, %v1558_v54  ;;  %v928_v4 = vmul.f32 0.5, %v2522_v58 }
 0x145   : > { %v2524_v62 = vpop.eup %2523  ;;  %2529 = vtanh.f32 %v838_v52  ;;  %v1468_v63 = vmul.f32 0.5, %v1366_v60  ;;  %v1029_v2 = vadd.f32 0.5, %v965_v59 }
 0x146   : > { %v2904_v3 = vmul.f32 %v1622_v61, %v1271_v26  ;;  %v1595_v7 = vmul.f32 0.5, %v2524_v62  ;;  %v992_v18 = vadd.f32 0.5, %v928_v4 }
 0x147   : > { %2531 = vtanh.f32 %v1468_v63  ;;  %v1093_v6 = vmul.f32 %v1029_v2, %v762_v28  ;;  %v767_v8 = vpop.f32.mrf.mxu2 }
 0x148   : > { %v1276_v5 = vpop.f32.mrf.mxu1  ;;  %v1749_v9 = vpack.c.bf16 %v2904_v3, %v2901_v0  ;;  %v839_v11 = vmul.f32 0.5, %v767_v8  ;;  %v1659_v20 = vadd.f32 0.5, %v1595_v7  ;;  %v1056_v27 = vmul.f32 %v992_v18, %v2885_v32 }
 0x149   : > { %v2526_v10 = vpop.eup %2525  ;;  %v1432_v12 = vmul.f32 0.5, %v1276_v5  ;;  %v2908_v14 = vpop.f32.mrf.mxu0  ;;  %v1128_v16 = vpack.c.bf16 %v1093_v6, %v1092_v1 }
 0x14a   : > { %v2528_v15 = vpop.eup %2527  ;;  %v802_v13 = vmul.f32 0.5, %v2908_v14  ;;  %v1559_v23 = vmul.f32 0.5, %v2526_v10  ;;  %v2918_v30 = vmul.f32 %v1659_v20, %v2889_v39 }
 0x14b   : > { %v2530_v17 = vpop.eup %2529  ;;  %v929_v19 = vmul.f32 0.5, %v2528_v15  ;;  %2533 = vtanh.f32 %v1432_v12  ;;  %2276 = vmatmul.msk.bf16.gmra.mxu3 %vm514_vm0, %v1128_v16 }
 0x14c   : > { %v2912_v21 = vpop.f32.mrf.mxu3  ;;  %2535 = vtanh.f32 %v839_v11  ;;  %v966_v25 = vmul.f32 0.5, %v2530_v17  ;;  %v1623_v35 = vadd.f32 0.5, %v1559_v23 }
 0x14d   : > { %v2532_v22 = vpop.eup %2531  ;;  %v993_v24 = vadd.f32 0.5, %v929_v19  ;;  %2537 = vtanh.f32 %v802_v13 }
 0x14e   : > { %v1596_v26 = vmul.f32 0.5, %v2532_v22  ;;  %v1030_v32 = vadd.f32 0.5, %v966_v25 }
 0x14f   : > { %v1057_v28 = vmul.f32 %v993_v24, %v672_v51  ;;  %v2920_v33 = vpop.f32.mrf.mxu2  ;;  %v2932_v51 = vmul.f32 %v1623_v35, %v2893_v46 }
 0x150   : > { %v2915_v29 = vpop.f32.mrf.mxu1  ;;  %v1660_v31 = vadd.f32 0.5, %v1596_v26  ;;  %v840_v40 = vmul.f32 0.5, %v2920_v33  ;;  %v1094_v52 = vmul.f32 %v1030_v32, %v2895_v47 }
 0x151   : > { %v2534_v34 = vpop.eup %2533  ;;  %v1110_v36 = vpack.c.bf16 %v1057_v28, %v1056_v27  ;;  %v1433_v37 = vmul.f32 0.5, %v2915_v29  ;;  %v677_v38 = vpop.f32.mrf.mxu0 }
 0x152   : > { %v1560_v41 = vmul.f32 0.5, %v2534_v34  ;;  %v803_v42 = vmul.f32 0.5, %v677_v38  ;;  %v2924_v43 = vmul.f32 %v1660_v31, %v1366_v60  ;;  %v2536_v44 = vpop.eup %2535 }
 0x153   : > { %2539 = vtanh.f32 %v1433_v37  ;;  %2258 = vmatmul.msk.bf16.gmra.mxu1 %vm514_vm0, %v1110_v36  ;;  %v2538_v39 = vpop.eup %2537  ;;  %v967_v45 = vmul.f32 0.5, %v2536_v44 }
 0x154   : > { %2541 = vtanh.f32 %v803_v42  ;;  %v2927_v48 = vpop.f32.mrf.mxu3  ;;  %v1624_v49 = vadd.f32 0.5, %v1560_v41  ;;  %v1768_v50 = vpack.c.bf16 %v2924_v43, %v2918_v30  ;;  %v930_v55 = vmul.f32 0.5, %v2538_v39 }
 0x155   : > { %2543 = vtanh.f32 %v840_v40  ;;  %v1031_v53 = vadd.f32 0.5, %v967_v45 }
 0x156   : > { %v2935_v54 = vmul.f32 %v1624_v49, %v1276_v5  ;;  %v994_v4 = vadd.f32 0.5, %v930_v55 }
 0x157   : > { %v1095_v57 = vmul.f32 %v1031_v53, %v767_v8  ;;  %v772_v58 = vpop.f32.mrf.mxu2 }
 0x158   : > { %v1281_v56 = vpop.f32.mrf.mxu1  ;;  %v1750_v59 = vpack.c.bf16 %v2935_v54, %v2932_v51  ;;  %v841_v63 = vmul.f32 0.5, %v772_v58  ;;  %v1058_v12 = vmul.f32 %v994_v4, %v2908_v14 }
 0x159   : > { %v2540_v60 = vpop.eup %2539  ;;  %v1434_v61 = vmul.f32 0.5, %v1281_v56  ;;  %v2939_v62 = vpop.f32.mrf.mxu0  ;;  %v1129_v2 = vpack.c.bf16 %v1095_v57, %v1094_v52 }
 0x15a   : > { %v2542_v1 = vpop.eup %2541  ;;  %v804_v46 = vmul.f32 0.5, %v2939_v62  ;;  %v1561_v8 = vmul.f32 0.5, %v2540_v60 }
 0x15b   : > { %v2544_v47 = vpop.eup %2543  ;;  %v931_v5 = vmul.f32 0.5, %v2542_v1  ;;  %2545 = vtanh.f32 %v1434_v61  ;;  %2277 = vmatmul.msk.bf16.gmra.mxu3 %vm514_vm0, %v1129_v2 }
 0x15c   : > { %v2943_v6 = vpop.f32.mrf.mxu3  ;;  %2547 = vtanh.f32 %v841_v63  ;;  %v968_v10 = vmul.f32 0.5, %v2544_v47  ;;  %v1625_v22 = vadd.f32 0.5, %v1561_v8 }
 0x15d   : > { %v995_v7 = vadd.f32 0.5, %v931_v5  ;;  %2549 = vtanh.f32 %v804_v46 }
 0x15e   : > { %v1032_v25 = vadd.f32 0.5, %v968_v10  ;;  %v2956_v34 = vmul.f32 %v1625_v22, %v2915_v29 }
 0x15f   : > { %v1059_v11 = vmul.f32 %v995_v7, %v677_v38  ;;  %v2948_v13 = vpop.f32.mrf.mxu2 }
 0x160   : > { %v2946_v15 = vpop.f32.mrf.mxu1  ;;  %v842_v20 = vmul.f32 0.5, %v2948_v13  ;;  %v1096_v35 = vmul.f32 %v1032_v25, %v2920_v33 }
 0x161   : > { %v2546_v16 = vpop.eup %2545  ;;  %v1111_v17 = vpack.c.bf16 %v1059_v11, %v1058_v12  ;;  %v1435_v18 = vmul.f32 0.5, %v2946_v15  ;;  %v682_v19 = vpop.f32.mrf.mxu0 }
 0x162   : > { %v1562_v23 = vmul.f32 0.5, %v2546_v16  ;;  %v805_v24 = vmul.f32 0.5, %v682_v19  ;;  %v2548_v26 = vpop.eup %2547 }
 0x163   : > { %2551 = vtanh.f32 %v1435_v18  ;;  %2259 = vmatmul.msk.bf16.gmra.mxu1 %vm514_vm0, %v1111_v17  ;;  %v2550_v14 = vpop.eup %2549  ;;  %v969_v27 = vmul.f32 0.5, %v2548_v26 }
 0x164   : > { %2553 = vtanh.f32 %v805_v24  ;;  %v2953_v28 = vpop.f32.mrf.mxu3  ;;  %v1626_v31 = vadd.f32 0.5, %v1562_v23  ;;  %v932_v38 = vmul.f32 0.5, %v2550_v14 }
 0x165   : > { %2555 = vtanh.f32 %v842_v20  ;;  %v1033_v36 = vadd.f32 0.5, %v969_v27 }
 0x166   : > { %v2959_v37 = vmul.f32 %v1626_v31, %v1281_v56  ;;  %v996_v57 = vadd.f32 0.5, %v932_v38 }
 0x167   : > { %v1097_v41 = vmul.f32 %v1033_v36, %v772_v58  ;;  %v777_v42 = vpop.f32.mrf.mxu2 }
 0x168   : > { %v1286_v40 = vpop.f32.mrf.mxu1  ;;  %v1751_v32 = vpack.c.bf16 %v2959_v37, %v2956_v34  ;;  %v843_v49 = vmul.f32 0.5, %v777_v42  ;;  %v1060_v63 = vmul.f32 %v996_v57, %v2939_v62 }
 0x169   : > { %v2552_v44 = vpop.eup %2551  ;;  %v1436_v39 = vmul.f32 0.5, %v1286_v40  ;;  %v685_v45 = vpop.f32.mrf.mxu0  ;;  %v1130_v29 = vpack.c.bf16 %v1097_v41, %v1096_v35 }
 0x16a   : > { %v2554_v52 = vpop.eup %2553  ;;  %v806_v53 = vmul.f32 0.5, %v685_v45  ;;  %v1563_v60 = vmul.f32 0.5, %v2552_v44 }
 0x16b   : > { %v2556_v55 = vpop.eup %2555  ;;  %v933_v33 = vmul.f32 0.5, %v2554_v52  ;;  %2557 = vtanh.f32 %v1436_v39  ;;  %2278 = vmatmul.msk.bf16.gmra.mxu3 %vm514_vm0, %v1130_v29 }
 0x16c   : > { %v2964_v56 = vpop.f32.mrf.mxu3  ;;  %2559 = vtanh.f32 %v843_v49  ;;  %v970_v61 = vmul.f32 0.5, %v2556_v55  ;;  %v1627_v7 = vadd.f32 0.5, %v1563_v60 }
 0x16d   : > { %v997_v58 = vadd.f32 0.5, %v933_v33  ;;  %2561 = vtanh.f32 %v806_v53 }
 0x16e   : > { %v1034_v12 = vadd.f32 0.5, %v970_v61  ;;  %v2971_v62 = vmul.f32 %v1627_v7, %v2946_v15 }
 0x16f   : > { %v1061_v1 = vmul.f32 %v997_v58, %v682_v19 }
 0x170   : > { %v1289_v46 = vpop.f32.mrf.mxu1  ;;  %v1098_v19 = vmul.f32 %v1034_v12, %v2948_v13 }
 0x171   : > { %v2558_v2 = vpop.eup %2557  ;;  %v1112_v47 = vpack.c.bf16 %v1061_v1, %v1060_v63  ;;  %v1437_v4 = vmul.f32 0.5, %v1289_v46  ;;  %v687_v5 = vpop.f32.mrf.mxu0 }
 0x172   : > { %v1564_v8 = vmul.f32 0.5, %v2558_v2  ;;  %v807_v10 = vmul.f32 0.5, %v687_v5  ;;  %v2560_v11 = vpop.eup %2559 }
 0x173   : > { %2260 = vmatmul.msk.bf16.gmra.mxu1 %vm514_vm0, %v1112_v47  ;;  %v2562_v16 = vpop.eup %2561  ;;  %v971_v17 = vmul.f32 0.5, %v2560_v11 }
 0x174   : > { %2563 = vtanh.f32 %v807_v10  ;;  %v2968_v18 = vpop.f32.mrf.mxu3  ;;  %v1628_v20 = vadd.f32 0.5, %v1564_v8  ;;  %v934_v24 = vmul.f32 0.5, %v2562_v16 }
 0x175   : > { %2565 = vtanh.f32 %v1437_v4  ;;  %v1035_v22 = vadd.f32 0.5, %v971_v17 }
 0x176   : > { %v2974_v23 = vmul.f32 %v1628_v20, %v1286_v40  ;;  %v998_v44 = vadd.f32 0.5, %v934_v24 }
 0x177   : > { %v1099_v26 = vmul.f32 %v1035_v22, %v777_v42 }
 0x178   : > { %v1291_v25 = vpop.f32.mrf.mxu1  ;;  %v1752_v14 = vpack.c.bf16 %v2974_v23, %v2971_v62  ;;  %v1062_v42 = vmul.f32 %v998_v44, %v685_v45 }
 0x179   : > { %v1438_v27 = vmul.f32 0.5, %v1291_v25  ;;  %v690_v31 = vpop.f32.mrf.mxu0  ;;  %v1131_v38 = vpack.c.bf16 %v1099_v26, %v1098_v19 }
 0x17a   : > { %v2564_v35 = vpop.eup %2563  ;;  %v808_v36 = vmul.f32 0.5, %v690_v31 }
 0x17b   : > { %v2566_v41 = vpop.eup %2565  ;;  %v935_v15 = vmul.f32 0.5, %v2564_v35  ;;  %2567 = vtanh.f32 %v1438_v27  ;;  %2279 = vmatmul.msk.bf16.gmra.mxu3 %vm514_vm0, %v1131_v38 }
 0x17c   : > { %v2979_v13 = vpop.f32.mrf.mxu3  ;;  %v1565_v39 = vmul.f32 0.5, %v2566_v41  ;;  %2569 = vtanh.f32 %v808_v36 }
 0x17d   : > { %v999_v40 = vadd.f32 0.5, %v935_v15 }
 0x17e   : > { %v1629_v57 = vadd.f32 0.5, %v1565_v39 }
 0x17f   : > { %v1063_v49 = vmul.f32 %v999_v40, %v687_v5 }
 0x180   : > { %v2981_v52 = vpop.f32.mrf.mxu1  ;;  %v2986_v1 = vmul.f32 %v1629_v57, %v1289_v46 }
 0x181   : > { %v2568_v53 = vpop.eup %2567  ;;  %v1113_v29 = vpack.c.bf16 %v1063_v49, %v1062_v42  ;;  %v692_v55 = vpop.f32.mrf.mxu0 }
 0x182   : > { %v1566_v33 = vmul.f32 0.5, %v2568_v53  ;;  %v809_v58 = vmul.f32 0.5, %v692_v55  ;;  %v2570_v60 = vpop.eup %2569 }
 0x183   : > { %2261 = vmatmul.msk.bf16.gmra.mxu1 %vm514_vm0, %v1113_v29  ;;  %v936_v45 = vmul.f32 0.5, %v2570_v60 }
 0x184   : > { %2571 = vtanh.f32 %v809_v58  ;;  %v2984_v61 = vpop.f32.mrf.mxu3  ;;  %v1630_v63 = vadd.f32 0.5, %v1566_v33 }
 0x185   : > { %v1000_v10 = vadd.f32 0.5, %v936_v45 }
 0x186   : > { %v2988_v2 = vmul.f32 %v1630_v63, %v1291_v25 }
 0x187   : > { %v1064_v20 = vmul.f32 %v1000_v10, %v690_v31 }
 0x188   : > { %v2990_v47 = vpop.f32.mrf.mxu1  ;;  %v1753_v4 = vpack.c.bf16 %v2988_v2, %v2986_v1 }
 0x189   : > { %v695_v5 = vpop.f32.mrf.mxu0 }
 0x18a   : > { %v2572_v7 = vpop.eup %2571  ;;  %v810_v8 = vmul.f32 0.5, %v695_v5 }
 0x18b   : > { %v937_v12 = vmul.f32 0.5, %v2572_v7 }
 0x18c   : > { %v1389_v11 = vpop.f32.mrf.mxu3  ;;  %2573 = vtanh.f32 %v810_v8 }
 0x18d   : > { %v1001_v16 = vadd.f32 0.5, %v937_v12  ;;  %v1477_v17 = vmul.f32 0.5, %v1389_v11 }
 0x18f   : > { %v1065_v46 = vmul.f32 %v1001_v16, %v692_v55  ;;  %2575 = vtanh.f32 %v1477_v17 }
 0x190   : > { %v2994_v19 = vpop.f32.mrf.mxu1 }
 0x191   : > { %v1114_v22 = vpack.c.bf16 %v1065_v46, %v1064_v20  ;;  %v697_v24 = vpop.f32.mrf.mxu0 }
 0x192   : > { %v811_v25 = vmul.f32 0.5, %v697_v24  ;;  %v2574_v26 = vpop.eup %2573 }
 0x193   : > { %2262 = vmatmul.msk.bf16.gmra.mxu1 %vm514_vm0, %v1114_v22  ;;  %v938_v38 = vmul.f32 0.5, %v2574_v26  ;;  %v1440_v26 = vmul.f32 0.5, %v2990_v47 }
 0x194   : > { %2577 = vtanh.f32 %v811_v25  ;;  %v1391_v27 = vpop.f32.mrf.mxu3 }
 0x195   : > { %v2576_v35 = vpop.eup %2575  ;;  %v1478_v36 = vmul.f32 0.5, %v1391_v27  ;;  %v1002_v39 = vadd.f32 0.5, %v938_v38 }
 0x196   : > { %v1605_v44 = vmul.f32 0.5, %v2576_v35  ;;  %v1439_v35 = vmul.f32 0.5, %v2981_v52 }
 0x197   : > { %2579 = vtanh.f32 %v1478_v36  ;;  %v1066_v58 = vmul.f32 %v1002_v39, %v695_v5  ;;  %v1441_v5 = vmul.f32 0.5, %v2994_v19 }
 0x198   : > { %v2997_v41 = vpop.f32.mrf.mxu1  ;;  %v1669_v49 = vadd.f32 0.5, %v1605_v44 }
 0x199   : > { %v700_v31 = vpop.f32.mrf.mxu0  ;;  %v1442_v16 = vmul.f32 0.5, %v2997_v41 }
 0x19a   : > { %v2578_v15 = vpop.eup %2577  ;;  %v812_v40 = vmul.f32 0.5, %v700_v31  ;;  %v3001_v45 = vmul.f32 %v1669_v49, %v1389_v11 }
 0x19b   : > { %v939_v42 = vmul.f32 0.5, %v2578_v15 }
 0x19c   : > { %v1394_v53 = vpop.f32.mrf.mxu3  ;;  %2581 = vtanh.f32 %v812_v40 }
 0x19d   : > { %v2580_v29 = vpop.eup %2579  ;;  %v1003_v55 = vadd.f32 0.5, %v939_v42  ;;  %v1479_v57 = vmul.f32 0.5, %v1394_v53 }
 0x19e   : > { %v1606_v33 = vmul.f32 0.5, %v2580_v29 }
 0x19f   : > { %v1067_v60 = vmul.f32 %v1003_v55, %v697_v24  ;;  %2583 = vtanh.f32 %v1479_v57 }
 0x1a0   : > { %v2999_v63 = vpop.f32.mrf.mxu1  ;;  %v1670_v7 = vadd.f32 0.5, %v1606_v33 }
 0x1a1   : > { %v1115_v8 = vpack.c.bf16 %v1067_v60, %v1066_v58  ;;  %v1443_v10 = vmul.f32 0.5, %v2999_v63  ;;  %v702_v12 = vpop.f32.mrf.mxu0 }
 0x1a2   : > { %v3005_v17 = vmul.f32 %v1670_v7, %v1391_v27  ;;  %v813_v20 = vmul.f32 0.5, %v702_v12  ;;  %v2582_v46 = vpop.eup %2581 }
 0x1a3   : > { %2263 = vmatmul.msk.bf16.gmra.mxu1 %vm514_vm0, %v1115_v8  ;;  %v940_v27 = vmul.f32 0.5, %v2582_v46 }
 0x1a4   : > { %v1396_v11 = vpop.f32.mrf.mxu3  ;;  %2585 = vtanh.f32 %v813_v20 }
 0x1a5   : > { %v2584_v24 = vpop.eup %2583  ;;  %2587 = vtanh.f32 %v1443_v10  ;;  %v1480_v25 = vmul.f32 0.5, %v1396_v11  ;;  %v1004_v49 = vadd.f32 0.5, %v940_v27 }
 0x1a6   : > { %2589 = vtanh.f32 %v1442_v16  ;;  %v1607_v38 = vmul.f32 0.5, %v2584_v24 }
 0x1a7   : > { %2591 = vtanh.f32 %v1480_v25  ;;  %v1068_v20 = vmul.f32 %v1004_v49, %v700_v31 }
 0x1a8   : > { %2593 = vtanh.f32 %v1441_v5  ;;  %v1306_v36 = vpop.f32.mrf.mxu1  ;;  %v1671_v57 = vadd.f32 0.5, %v1607_v38 }
 0x1a9   : > { %v1444_v44 = vmul.f32 0.5, %v1306_v36  ;;  %v3013_v15 = vpop.f32.mrf.mxu0  ;;  %2595 = vtanh.f32 %v1440_v26 }
 0x1aa   : > { %v2586_v40 = vpop.eup %2585  ;;  %v814_v39 = vmul.f32 0.5, %v3013_v15  ;;  %v3021_v26 = vmul.f32 %v1671_v57, %v1394_v53 }
 0x1ab   : > { %v2588_v42 = vpop.eup %2587  ;;  %2597 = vtanh.f32 %v1444_v44  ;;  %v941_v29 = vmul.f32 0.5, %v2586_v40 }
 0x1ac   : > { %v2590_v55 = vpop.eup %2589  ;;  %2599 = vtanh.f32 %v1439_v35  ;;  %v3016_v58 = vpop.f32.mrf.mxu3  ;;  %v1571_v8 = vmul.f32 0.5, %v2588_v42 }
 0x1ad   : > { %v2592_v33 = vpop.eup %2591  ;;  %v1005_v60 = vadd.f32 0.5, %v941_v29  ;;  %v1481_v16 = vmul.f32 0.5, %v3016_v58  ;;  %2601 = vtanh.f32 %v814_v39  ;;  %v1570_v24 = vmul.f32 0.5, %v2590_v55 }
 0x1ae   : > { %v2594_v7 = vpop.eup %2593  ;;  %v1608_v10 = vmul.f32 0.5, %v2592_v33  ;;  %v1635_v33 = vadd.f32 0.5, %v1571_v8 }
 0x1af   : > { %v1069_v46 = vmul.f32 %v1005_v60, %v702_v12  ;;  %v2596_v5 = vpop.eup %2595  ;;  %2603 = vtanh.f32 %v1481_v16  ;;  %v1569_v38 = vmul.f32 0.5, %v2594_v7  ;;  %v1634_v55 = vadd.f32 0.5, %v1570_v24 }
 0x1b0   : > { %v3019_v25 = vpop.f32.mrf.mxu1  ;;  %v1672_v27 = vadd.f32 0.5, %v1608_v10  ;;  %v1568_v12 = vmul.f32 0.5, %v2596_v5  ;;  %v1471_v7 = vmul.f32 0.5, %v2943_v6  ;;  %v1699_v16 = vmul.f32 %v1635_v33, %v2999_v63 }
 0x1b1   : > { %v2598_v35 = vpop.eup %2597  ;;  %v1445_v44 = vmul.f32 0.5, %v3019_v25  ;;  %v1116_v40 = vpack.c.bf16 %v1069_v46, %v1068_v20  ;;  %v707_v42 = vpop.f32.mrf.mxu0 }
 0x1b2   : > { %v2600_v29 = vpop.eup %2599  ;;  %v1572_v22 = vmul.f32 0.5, %v2598_v35  ;;  %v3024_v39 = vmul.f32 %v1672_v27, %v1396_v11  ;;  %v815_v31 = vmul.f32 0.5, %v707_v42  ;;  %v1633_v11 = vadd.f32 0.5, %v1569_v38 }
 0x1b3   : > { %2264 = vmatmul.msk.bf16.gmra.mxu1 %vm514_vm0, %v1116_v40  ;;  %v2602_v49 = vpop.eup %2601  ;;  %v1567_v60 = vmul.f32 0.5, %v2600_v29  ;;  %v1698_v35 = vmul.f32 %v1634_v55, %v2997_v41  ;;  %v1632_v40 = vadd.f32 0.5, %v1568_v12  ;;  %v1475_v29 = vmul.f32 0.5, %v2979_v13 }
 0x1b4   : > { %v1636_v53 = vadd.f32 0.5, %v1572_v22  ;;  %v1774_v57 = vpack.c.bf16 %v3024_v39, %v3021_v26  ;;  %2605 = vtanh.f32 %v815_v31  ;;  %v3030_v10 = vpop.f32.mrf.mxu3  ;;  %v1472_v22 = vmul.f32 0.5, %v2953_v28  ;;  %v2401_v26 = vld [vmem:[%s3338_s3 + $0x74] sm:$0xf] }
 0x1b5   : > { %2607 = vtanh.f32 %v1445_v44  ;;  %v2604_v8 = vpop.eup %2603  ;;  %v1482_v46 = vmul.f32 0.5, %v3030_v10  ;;  %v942_v5 = vmul.f32 0.5, %v2602_v49  ;;  %v1697_v33 = vmul.f32 %v1633_v11, %v2994_v19 }
 0x1b6   : > { %v1700_v20 = vmul.f32 %v1636_v53, %v1306_v36  ;;  %v1609_v38 = vmul.f32 0.5, %v2604_v8  ;;  %v1631_v36 = vadd.f32 0.5, %v1567_v60  ;;  %v1476_v41 = vmul.f32 0.5, %v2984_v61 }
 0x1b7   : > { %2609 = vtanh.f32 %v1482_v46  ;;  %v1006_v12 = vadd.f32 0.5, %v942_v5  ;;  %v1755_v8 = vpack.c.bf16 %v1698_v35, %v1697_v33  ;;  %v1474_v60 = vmul.f32 0.5, %v2968_v18 }
 0x1b8   : > { %v3035_v24 = vpop.f32.mrf.mxu1  ;;  %v1756_v27 = vpack.c.bf16 %v1700_v20, %v1699_v16  ;;  %2611 = vtanh.f32 %v1471_v7  ;;  %v1473_v16 = vmul.f32 0.5, %v2964_v56  ;;  %v1696_v20 = vmul.f32 %v1632_v40, %v2990_v47 }
 0x1b9   : > { %v1446_v44 = vmul.f32 0.5, %v3035_v24  ;;  %v3040_v31 = vpop.f32.mrf.mxu0  ;;  %v1673_v19 = vadd.f32 0.5, %v1609_v38  ;;  %v1070_v35 = vmul.f32 %v1006_v12, %v3013_v15 }
 0x1ba   : > { %v2606_v63 = vpop.eup %2605  ;;  %1782 = vmatpush.bf16.msrb.mxu2 %v1756_v27  ;;  %v816_v49 = vmul.f32 0.5, %v3040_v31  ;;  %v1695_v27 = vmul.f32 %v1631_v36, %v2981_v52 }
 0x1bb   : > { %v2608_v53 = vpop.eup %2607  ;;  %2613 = vtanh.f32 %v1446_v44  ;;  %v943_v55 = vmul.f32 0.5, %v2606_v63  ;;  %v3057_v52 = vmul.f32 %v1673_v19, %v3016_v58  ;;  %v1469_v19 = vmul.f32 0.5, %v2912_v21 }
 0x1bc   : > { %2615 = vtanh.f32 %v1472_v22  ;;  %v3048_v7 = vpop.f32.mrf.mxu3  ;;  %v1573_v44 = vmul.f32 0.5, %v2608_v53 }
 0x1bd   : > { %2617 = vtanh.f32 %v1475_v29  ;;  %v1007_v11 = vadd.f32 0.5, %v943_v55  ;;  %v2610_v46 = vpop.eup %2609  ;;  %v1483_v5 = vmul.f32 0.5, %v3048_v7  ;;  %v1754_v29 = vpack.c.bf16 %v1696_v20, %v1695_v27 }
 0x1be   : > { %1783 = vmatpush.bf16.msrb.mxu2 %v1755_v8  ;;  %2619 = vtanh.f32 %v816_v49  ;;  %v1610_v22 = vmul.f32 0.5, %v2610_v46  ;;  %v2612_v40 = vpop.eup %2611 }
 0x1bf   : > { %2621 = vtanh.f32 %v1476_v41  ;;  %v1071_v47 = vmul.f32 %v1007_v11, %v707_v42  ;;  %v1637_v41 = vadd.f32 0.5, %v1573_v44  ;;  %v1470_v44 = vmul.f32 0.5, %v2927_v48 }
 0x1c0   : > { %v3053_v63 = vpop.f32.mrf.mxu1  ;;  %2623 = vtanh.f32 %v1483_v5  ;;  %v1674_v36 = vadd.f32 0.5, %v1610_v22 }
 0x1c1   : > { %v2614_v38 = vpop.eup %2613  ;;  %v1447_v33 = vmul.f32 0.5, %v3053_v63  ;;  %v1117_v53 = vpack.c.bf16 %v1071_v47, %v1070_v35  ;;  %v712_v55 = vpop.f32.mrf.mxu0  ;;  %2625 = vtanh.f32 %v1473_v16 }
 0x1c2   : > { %v2616_v49 = vpop.eup %2615  ;;  %v1574_v8 = vmul.f32 0.5, %v2614_v38  ;;  %1784 = vmatpush.bf16.msrb.mxu2 %v1754_v29  ;;  %v817_v15 = vmul.f32 0.5, %v712_v55  ;;  %2627 = vtanh.f32 %v1474_v60  ;;  %v3060_v12 = vmul.f32 %v1674_v36, %v3030_v10 }
 0x1c3   : > { %v2618_v42 = vpop.eup %2617  ;;  %2265 = vmatmul.msk.bf16.gmra.mxu1 %vm514_vm0, %v1117_v53  ;;  %v3068_v60 = vmul.f32 %v1637_v41, %v3019_v25 }
 0x1c4   : > { %v2620_v20 = vpop.eup %2619  ;;  %v1638_v11 = vadd.f32 0.5, %v1574_v8  ;;  %2629 = vtanh.f32 %v817_v15  ;;  %v1775_v16 = vpack.c.bf16 %v3060_v12, %v3057_v52  ;;  %v1406_v46 = vpop.f32.mrf.mxu3  ;;  %v1603_v47 = vmul.f32 0.5, %v2618_v42  ;;  %v2338_v52 = vld [vmem:[%s3338_s3 + $0x70] sm:$0xf]  ;;  %v2402_v12 = vld [vmem:[%s3338_s3 + $0x74] sm:$0xf0] }
 0x1c5   : > { %v2622_v58 = vpop.eup %2621  ;;  %2631 = vtanh.f32 %v1447_v33  ;;  %v1484_v5 = vmul.f32 0.5, %v1406_v46  ;;  %v944_v22 = vmul.f32 0.5, %v2620_v20  ;;  %v2339_v39 = vor.u32 %v2402_v12, %v2338_v52  ;;  %v1858_v12 = vld [vmem:[%s3339_s4] sm:$0x3] }
 0x1c6   : > { %v2624_v27 = vpop.eup %2623  ;;  %v3071_v10 = vmul.f32 %v1638_v11, %v3035_v24  ;;  %1785 = vmatpush.bf16.msrb.mxu2 %v1753_v4  ;;  %v1604_v29 = vmul.f32 0.5, %v2622_v58  ;;  %v1667_v15 = vadd.f32 0.5, %v1603_v47 }
 0x1c7   : > { %v2626_v35 = vpop.eup %2625  ;;  %2633 = vtanh.f32 %v1484_v5  ;;  %v1611_v53 = vmul.f32 0.5, %v2624_v27  ;;  %v1008_v4 = vadd.f32 0.5, %v944_v22  ;;  %v1600_v5 = vmul.f32 0.5, %v2616_v49 }
 0x1c8   : > { %v1316_v38 = vpop.f32.mrf.mxu1  ;;  %v1757_v33 = vpack.c.bf16 %v3071_v10, %v3068_v60  ;;  %v2628_v36 = vpop.eup %2627  ;;  %2635 = vtanh.f32 %v1469_v19  ;;  %v1601_v2 = vmul.f32 0.5, %v2626_v35  ;;  %v1668_v42 = vadd.f32 0.5, %v1604_v29 }
 0x1c9   : > { %v1448_v25 = vmul.f32 0.5, %v1316_v38  ;;  %2637 = vtanh.f32 %v1470_v44  ;;  %v1602_v8 = vmul.f32 0.5, %v2628_v36  ;;  %v1675_v20 = vadd.f32 0.5, %v1611_v53 }
 0x1ca   : > { %v2630_v24 = vpop.eup %2629  ;;  %1786 = vmatpush.bf16.msrb.mxu2 %v1752_v14  ;;  %v1599_v19 = vmul.f32 0.5, %v2612_v40  ;;  %v1665_v23 = vadd.f32 0.5, %v1601_v2  ;;  %v1072_v44 = vmul.f32 %v1008_v4, %v3040_v31  ;;  %v1731_v36 = vmul.f32 %v1667_v15, %v2979_v13 }
 0x1cb   : > { %v2632_v1 = vpop.eup %2631  ;;  %2639 = vtanh.f32 %v1448_v25  ;;  %v945_v41 = vmul.f32 0.5, %v2630_v24  ;;  %v1666_v29 = vadd.f32 0.5, %v1602_v8  ;;  %v1732_v40 = vmul.f32 %v1668_v42, %v2984_v61 }
 0x1cc   : > { %v1575_v27 = vmul.f32 0.5, %v2632_v1  ;;  %v1663_v2 = vadd.f32 0.5, %v1599_v19  ;;  %v1664_v4 = vadd.f32 0.5, %v1600_v5 }
 0x1cd   : > { %v1009_v11 = vadd.f32 0.5, %v945_v41  ;;  %v2634_v58 = vpop.eup %2633  ;;  %v1730_v8 = vmul.f32 %v1666_v29, %v2968_v18  ;;  %v1772_v15 = vpack.c.bf16 %v1732_v40, %v1731_v36 }
 0x1ce   : > { %1787 = vmatpush.bf16.msrb.mxu2 %v1751_v32  ;;  %v2636_v62 = vpop.eup %2635  ;;  %v1612_v14 = vmul.f32 0.5, %v2634_v58  ;;  %v3085_v22 = vpop.f32.mrf.mxu3  ;;  %v3094_v32 = vmul.f32 %v1675_v20, %v3048_v7  ;;  %v1639_v24 = vadd.f32 0.5, %v1575_v27  ;;  %v1729_v7 = vmul.f32 %v1665_v23, %v2964_v56 }
 0x1cf   : > { %v1073_v35 = vmul.f32 %v1009_v11, %v712_v55  ;;  %v2638_v47 = vpop.eup %2637  ;;  %v1485_v25 = vmul.f32 0.5, %v3085_v22  ;;  %v1597_v13 = vmul.f32 0.5, %v2636_v62  ;;  %v1727_v19 = vmul.f32 %v1663_v2, %v2943_v6 }
 0x1d0   : > { %v3089_v49 = vpop.f32.mrf.mxu1  ;;  %v1676_v31 = vadd.f32 0.5, %v1612_v14  ;;  %v1598_v61 = vmul.f32 0.5, %v2638_v47  ;;  %v3107_v54 = vmul.f32 %v1639_v24, %v3053_v63  ;;  %v1728_v63 = vmul.f32 %v1664_v4, %v2953_v28 }
 0x1d1   : > { %v2640_v34 = vpop.eup %2639  ;;  %v1449_v37 = vmul.f32 0.5, %v3089_v49  ;;  %v1118_v53 = vpack.c.bf16 %v1073_v35, %v1072_v44  ;;  %2641 = vtanh.f32 %v1485_v25  ;;  %v1661_v42 = vadd.f32 0.5, %v1597_v13 }
 0x1d2   : > { %v1576_v55 = vmul.f32 0.5, %v2640_v34  ;;  %1788 = vmatpush.bf16.msrb.mxu2 %v1750_v59  ;;  %v3099_v1 = vmul.f32 %v1676_v31, %v1406_v46  ;;  %v1662_v20 = vadd.f32 0.5, %v1598_v61  ;;  %v1771_v5 = vpack.c.bf16 %v1730_v8, %v1729_v7 }
 0x1d3   : > { %2266 = vmatmul.msk.bf16.gmra.mxu1 %vm514_vm0, %v1118_v53  ;;  %2643 = vtanh.f32 %v1449_v37  ;;  %v1725_v3 = vmul.f32 %v1661_v42, %v2912_v21  ;;  %v1770_v62 = vpack.c.bf16 %v1728_v63, %v1727_v19 }
 0x1d4   : > { %v1640_v41 = vadd.f32 0.5, %v1576_v55  ;;  %v1776_v51 = vpack.c.bf16 %v3099_v1, %v3094_v32  ;;  %v3341_v1 = vpack.c.bf16 %v3005_v17, %v3001_v45  ;;  %v2340_v45 = vld [vmem:[%s3338_s3 + $0x78] sm:$0xf0]  ;;  %v2330_v17 = vld [vmem:[%s3338_s3 + $0x60] sm:$0xf] }
 0x1d6   : > { %v3109_v59 = vmul.f32 %v1640_v41, %v1316_v38  ;;  %1789 = vmatpush.bf16.msrb.mxu2 %v1749_v9  ;;  %v1411_v46 = vpop.f32.mrf.mxu3  ;;  %v1726_v9 = vmul.f32 %v1662_v20, %v2927_v48 }
 0x1d7   : > { %v2642_v56 = vpop.eup %2641  ;;  %v1486_v11 = vmul.f32 0.5, %v1411_v46 }
 0x1d8   : > { %v1321_v18 = vpop.f32.mrf.mxu1  ;;  %v1758_v58 = vpack.c.bf16 %v3109_v59, %v3107_v54  ;;  %v1613_v0 = vmul.f32 0.5, %v2642_v56  ;;  %v1769_v28 = vpack.c.bf16 %v1726_v9, %v1725_v3 }
 0x1d9   : > { %v1450_v38 = vmul.f32 0.5, %v1321_v18  ;;  %2645 = vtanh.f32 %v1486_v11  ;;  %v2644_v27 = vpop.eup %2643 }
 0x1da   : > { %1808 = vmatpush.bf16.msra.mxu2 %v1772_v15  ;;  %v1577_v23 = vmul.f32 0.5, %v2644_v27  ;;  %v1677_v14 = vadd.f32 0.5, %v1613_v0 }
 0x1db   : > { %2647 = vtanh.f32 %v1450_v38 }
 0x1dc   : > { %v1641_v36 = vadd.f32 0.5, %v1577_v23  ;;  %v3121_v25 = vmul.f32 %v1677_v14, %v3085_v22 }
 0x1de   : > { %1809 = vmatpush.bf16.msra.mxu2 %v1771_v5  ;;  %v3126_v37 = vmul.f32 %v1641_v36, %v3089_v49  ;;  %v3149_v27 = vpop.f32.mrf.mxu3 }
 0x1df   : > { %v2646_v44 = vpop.eup %2645 }
 0x1e0   : > { %v1324_v35 = vpop.f32.mrf.mxu1  ;;  %v1614_v29 = vmul.f32 0.5, %v2646_v44 }
 0x1e1   : > { %v2648_v6 = vpop.eup %2647  ;;  %v1451_v47 = vmul.f32 0.5, %v1324_v35 }
 0x1e2   : > { %1810 = vmatpush.bf16.msra.mxu2 %v1770_v62  ;;  %v1578_v40 = vmul.f32 0.5, %v2648_v6  ;;  %v1678_v34 = vadd.f32 0.5, %v1614_v29 }
 0x1e3   : > { %2649 = vtanh.f32 %v1451_v47 }
 0x1e4   : > { %v1642_v21 = vadd.f32 0.5, %v1578_v40  ;;  %v3123_v48 = vmul.f32 %v1678_v34, %v1411_v46 }
 0x1e6   : > { %1811 = vmatpush.bf16.msra.mxu2 %v1769_v28  ;;  %v3128_v31 = vmul.f32 %v1642_v21, %v1321_v18  ;;  %v1777_v53 = vpack.c.bf16 %v3123_v48, %v3121_v25  ;;  %v3153_v62 = vpop.f32.mrf.mxu3 }
 0x1e8   : > { %v1326_v22 = vpop.f32.mrf.mxu1  ;;  %v1759_v24 = vpack.c.bf16 %v3128_v31, %v3126_v37 }
 0x1e9   : > { %v1452_v55 = vmul.f32 0.5, %v1326_v22  ;;  %v2650_v13 = vpop.eup %2649 }
 0x1ea   : > { %1812 = vmatpush.bf16.msra.mxu2 %v1768_v50  ;;  %v1579_v61 = vmul.f32 0.5, %v2650_v13 }
 0x1eb   : > { %2651 = vtanh.f32 %v1452_v55 }
 0x1ec   : > { %v1643_v7 = vadd.f32 0.5, %v1579_v61 }
 0x1ee   : > { %v3137_v30 = vmul.f32 %v1643_v7, %v1324_v35  ;;  %v3155_v14 = vpop.f32.mrf.mxu3 }
 0x1f0   : > { %v1329_v2 = vpop.f32.mrf.mxu1 }
 0x1f1   : > { %v2652_v49 = vpop.eup %2651  ;;  %v1453_v4 = vmul.f32 0.5, %v1329_v2 }
 0x1f2   : > { %v1580_v41 = vmul.f32 0.5, %v2652_v49 }
 0x1f3   : > { %2653 = vtanh.f32 %v1453_v4 }
 0x1f4   : > { %v1644_v8 = vadd.f32 0.5, %v1580_v41 }
 0x1f6   : > { %v3139_v43 = vmul.f32 %v1644_v8, %v1326_v22  ;;  %v3157_v28 = vpop.f32.mrf.mxu3 }
 0x1f8   : > { %v1331_v50 = vpop.f32.mrf.mxu1  ;;  %v1760_v15 = vpack.c.bf16 %v3139_v43, %v3137_v30 }
 0x1f9   : > { %v1454_v46 = vmul.f32 0.5, %v1331_v50  ;;  %v2654_v56 = vpop.eup %2653 }
 0x1fa   : > { %v1581_v42 = vmul.f32 0.5, %v2654_v56 }
 0x1fb   : > { %2655 = vtanh.f32 %v1454_v46 }
 0x1fc   : > { %v1645_v11 = vadd.f32 0.5, %v1581_v42 }
 0x1fe   : > { %v3145_v38 = vmul.f32 %v1645_v11, %v1329_v2  ;;  %v3160_v61 = vpop.f32.mrf.mxu3 }
 0x200   : > { %v3143_v20 = vpop.f32.mrf.mxu1 }
 0x201   : > { %v2656_v18 = vpop.eup %2655  ;;  %v1455_v40 = vmul.f32 0.5, %v3143_v20 }
 0x202   : > { %v1582_v19 = vmul.f32 0.5, %v2656_v18 }
 0x204   : > { %v1646_v63 = vadd.f32 0.5, %v1582_v19 }
 0x206   : > { %v3147_v5 = vmul.f32 %v1646_v63, %v1331_v50 }
 0x208   : > { %v1336_v0 = vpop.f32.mrf.mxu1  ;;  %v1761_v3 = vpack.c.bf16 %v3147_v5, %v3145_v38 }
 0x209   : > { %v1456_v29 = vmul.f32 0.5, %v1336_v0 }
 0x210   : > { %v1339_v9 = vpop.f32.mrf.mxu1 }
 0x211   : > { %v1457_v47 = vmul.f32 0.5, %v1339_v9 }
 0x218   : > { %v1341_v23 = vpop.f32.mrf.mxu1 }
 0x219   : > { %v1458_v6 = vmul.f32 0.5, %v1341_v23 }
 0x220   : > { %v1344_v44 = vpop.f32.mrf.mxu1 }
 0x221   : > { %v1459_v35 = vmul.f32 0.5, %v1344_v44 }
 0x223   : > { %2657 = vtanh.f32 %v1459_v35 }
 0x224   : > { %2659 = vtanh.f32 %v1458_v6 }
 0x225   : > { %2661 = vtanh.f32 %v1457_v47 }
 0x226   : > { %2663 = vtanh.f32 %v1456_v29 }
 0x228   : > { %v1346_v36 = vpop.f32.mrf.mxu1 }
 0x229   : > { %v1460_v34 = vmul.f32 0.5, %v1346_v36  ;;  %v2658_v21 = vpop.eup %2657 }
 0x22a   : > { %v2660_v22 = vpop.eup %2659  ;;  %v1587_v55 = vmul.f32 0.5, %v2658_v21 }
 0x22b   : > { %2665 = vtanh.f32 %v1460_v34  ;;  %v2662_v13 = vpop.eup %2661  ;;  %v1586_v49 = vmul.f32 0.5, %v2660_v22  ;;  %v1426_v34 = vpop.f32.mrf.mxu3 }
 0x22c   : > { %2667 = vtanh.f32 %v1455_v40  ;;  %v2664_v2 = vpop.eup %2663  ;;  %v1585_v41 = vmul.f32 0.5, %v2662_v13  ;;  %v1651_v8 = vadd.f32 0.5, %v1587_v55  ;;  %v1491_v55 = vmul.f32 0.5, %v3160_v61 }
 0x22d   : > { %v1584_v56 = vmul.f32 0.5, %v2664_v2  ;;  %v1650_v42 = vadd.f32 0.5, %v1586_v49  ;;  %v1492_v2 = vmul.f32 0.5, %v1426_v34  ;;  %v2717_v49 = vmov 1065369472  }
 0x22e   : > { %v1649_v19 = vadd.f32 0.5, %v1585_v41  ;;  %v1715_v63 = vmul.f32 %v1651_v8, %v1344_v44  ;;  %1790 = vmatmul.bf16.vlgmr.msrb.gmra.mxu2 %v2717_v49  ;;  %2669 = vtanh.f32 %v1491_v55  ;;  %v1487_v8 = vmul.f32 0.5, %v3149_v27 }
 0x22f   : > { %v1648_v6 = vadd.f32 0.5, %v1584_v56  ;;  %v1714_v47 = vmul.f32 %v1650_v42, %v1341_v23  ;;  %v1489_v23 = vmul.f32 0.5, %v3155_v14  ;;  %2671 = vtanh.f32 %v1492_v2 }
 0x230   : > { %v3162_v4 = vpop.f32.mrf.mxu1  ;;  %v1713_v22 = vmul.f32 %v1649_v19, %v1339_v9 }
 0x231   : > { %v2666_v7 = vpop.eup %2665  ;;  %v1712_v13 = vmul.f32 %v1648_v6, %v1336_v0  ;;  %v1488_v0 = vmul.f32 0.5, %v3153_v62  ;;  %2673 = vtanh.f32 %v1489_v23 }
 0x232   : > { %v1588_v50 = vmul.f32 0.5, %v2666_v7  ;;  %v2668_v46 = vpop.eup %2667  ;;  %v1763_v7 = vpack.c.bf16 %v1714_v47, %v1713_v22 }
 0x233   : > { %v1583_v11 = vmul.f32 0.5, %v2668_v46 }
 0x234   : > { %v1652_v18 = vadd.f32 0.5, %v1588_v50  ;;  %v2670_v50 = vpop.eup %2669 }
 0x235   : > { %v1647_v21 = vadd.f32 0.5, %v1583_v11  ;;  %v2672_v46 = vpop.eup %2671  ;;  %v1619_v42 = vmul.f32 0.5, %v2670_v50 }
 0x236   : > { %v1716_v35 = vmul.f32 %v1652_v18, %v1346_v36  ;;  %v1490_v36 = vmul.f32 0.5, %v3157_v28  ;;  %v1620_v18 = vmul.f32 0.5, %v2672_v46 }
 0x237   : > { %v1711_v44 = vmul.f32 %v1647_v21, %v3143_v20  ;;  %v2674_v56 = vpop.eup %2673  ;;  %v1683_v47 = vadd.f32 0.5, %v1619_v42 }
 0x238   : > { %v1764_v29 = vpack.c.bf16 %v1716_v35, %v1715_v63  ;;  %v3164_v40 = vpop.f32.mrf.mxu1  ;;  %2675 = vtanh.f32 %v1490_v36  ;;  %v1617_v63 = vmul.f32 0.5, %v2674_v56 }
 0x239   : > { %v1762_v41 = vpack.c.bf16 %v1712_v13, %v1711_v44  ;;  %2677 = vtanh.f32 %v1487_v8  ;;  %v1747_v55 = vmul.f32 %v1683_v47, %v3160_v61  ;;  %v1462_v61 = vmul.f32 0.5, %v3164_v40 }
 0x23a   : > { %1795 = vmatpush.bf16.msrb.mxu3 %v1764_v29  ;;  %2679 = vtanh.f32 %v1488_v0  ;;  %v1684_v29 = vadd.f32 0.5, %v1620_v18 }
 0x23c   : > { %v1748_v13 = vmul.f32 %v1684_v29, %v1426_v34 }
 0x23e   : > { %1796 = vmatpush.bf16.msrb.mxu3 %v1763_v7  ;;  %v2676_v11 = vpop.eup %2675 }
 0x23f   : > { %v2678_v19 = vpop.eup %2677  ;;  %v1618_v6 = vmul.f32 0.5, %v2676_v11 }
 0x240   : > { %v3171_v9 = vpop.f32.mrf.mxu1  ;;  %v2680_v35 = vpop.eup %2679  ;;  %v1615_v38 = vmul.f32 0.5, %v2678_v19 }
 0x241   : > { %v1616_v5 = vmul.f32 0.5, %v2680_v35  ;;  %v1682_v22 = vadd.f32 0.5, %v1618_v6  ;;  %v1463_v2 = vmul.f32 0.5, %v3171_v9 }
 0x242   : > { %1797 = vmatpush.bf16.msrb.mxu3 %v1762_v41 }
 0x243   : > { %v1680_v7 = vadd.f32 0.5, %v1616_v5  ;;  %v1746_v31 = vmul.f32 %v1682_v22, %v3157_v28  ;;  %v1461_v28 = vmul.f32 0.5, %v3162_v4  ;;  %v2398_v5 = vld [vmem:[%s3338_s3 + $0x54] sm:$0xf0]  ;;  %v2324_v22 = vld [vmem:[%s3338_s3 + $0x58] sm:$0xf0] }
 0x245   : > { %v1744_v59 = vmul.f32 %v1680_v7, %v3153_v62 }
 0x246   : > { %1798 = vmatpush.bf16.msrb.mxu3 %v1761_v3  ;;  %v1681_v3 = vadd.f32 0.5, %v1617_v63 }
 0x248   : > { %v3178_v20 = vpop.f32.mrf.mxu1  ;;  %v1745_v37 = vmul.f32 %v1681_v3, %v3155_v14  ;;  %v2397_v3 = vld [vmem:[%s3338_s3 + $0x54] sm:$0xf] }
 0x249   : > { %v1464_v43 = vmul.f32 0.5, %v3178_v20 }
 0x24a   : > { %1799 = vmatpush.bf16.msrb.mxu3 %v1760_v15  ;;  %v1679_v15 = vadd.f32 0.5, %v1615_v38  ;;  %v1779_v14 = vpack.c.bf16 %v1746_v31, %v1745_v37  ;;  %v2316_v37 = vld [vmem:[%s3338_s3 + $0x48] sm:$0xf0]  ;;  %v2718_v31 = vmov 0.0  }
 0x24b   : > { %257 = vst [vmem:[#allocation2] sm:$0x1] %v2718_v31 }
 0x24c   : > { %v1743_v54 = vmul.f32 %v1679_v15, %v3149_v27  ;;  %v2395_v15 = vld [vmem:[%s3338_s3 + $0x44] sm:$0xf] }
 0x24e   : > { %1800 = vmatpush.bf16.msrb.mxu3 %v1759_v24  ;;  %v1780_v24 = vpack.c.bf16 %v1748_v13, %v1747_v55  ;;  %v1778_v10 = vpack.c.bf16 %v1744_v59, %v1743_v54  ;;  %v2327_v55 = vor.u32 %v2397_v3, %v2324_v22  ;;  %v2393_v54 = vld [vmem:[%s3338_s3 + $0x34] sm:$0xf] }
 0x250   : > { %v1359_v21 = vpop.f32.mrf.mxu1 }
 0x251   : > { %v1465_v30 = vmul.f32 0.5, %v1359_v21 }
 0x252   : > { %1801 = vmatpush.bf16.msrb.mxu3 %v1758_v58 }
 0x253   : > { %2681 = vtanh.f32 %v1465_v30  ;;  %v2314_v30 = vld [vmem:[%s3338_s3 + $0x40] sm:$0xf] }
 0x254   : > { %2683 = vtanh.f32 %v1464_v43  ;;  %v2396_v43 = vld [vmem:[%s3338_s3 + $0x44] sm:$0xf0] }
 0x255   : > { %2685 = vtanh.f32 %v1463_v2  ;;  %v2315_v7 = vor.u32 %v2396_v43, %v2314_v30  ;;  %v2306_v2 = vld [vmem:[%s3338_s3 + $0x30] sm:$0xf] }
 0x256   : > { %1802 = vmatpush.bf16.msrb.mxu3 %v1757_v33  ;;  %2687 = vtanh.f32 %v1462_v61  ;;  %v2394_v61 = vld [vmem:[%s3338_s3 + $0x34] sm:$0xf0] }
 0x257   : > { %v2307_v59 = vor.u32 %v2394_v61, %v2306_v2 }
 0x258   : > { %v1361_v58 = vpop.f32.mrf.mxu1 }
 0x259   : > { %v1466_v34 = vmul.f32 0.5, %v1361_v58  ;;  %1803 = vmatmul.bf16.vlgmr.msrb.gmra.mxu3 %v2717_v49  ;;  %v2682_v44 = vpop.eup %2681 }
 0x25a   : > { %1821 = vmatpush.bf16.msra.mxu3 %v1780_v24  ;;  %v2684_v60 = vpop.eup %2683  ;;  %v1593_v33 = vmul.f32 0.5, %v2682_v44  ;;  %v2319_v24 = vor.u32 %v2395_v15, %v2316_v37  ;;  %v2392_v44 = vld [vmem:[%s3338_s3 + $0x24] sm:$0xf0] }
 0x25b   : > { %2689 = vtanh.f32 %v1466_v34  ;;  %v2686_v23 = vpop.eup %2685  ;;  %v1592_v62 = vmul.f32 0.5, %v2684_v60  ;;  %v2298_v34 = vld [vmem:[%s3338_s3 + $0x20] sm:$0xf] }
 0x25c   : > { %2691 = vtanh.f32 %v1461_v28  ;;  %v2688_v27 = vpop.eup %2687  ;;  %v1591_v41 = vmul.f32 0.5, %v2686_v23  ;;  %v1657_v8 = vadd.f32 0.5, %v1593_v33  ;;  %v2299_v60 = vor.u32 %v2392_v44, %v2298_v34  ;;  %v2300_v33 = vld [vmem:[%s3338_s3 + $0x28] sm:$0xf0] }
 0x25d   : > { %v1590_v46 = vmul.f32 0.5, %v2688_v27  ;;  %v1656_v56 = vadd.f32 0.5, %v1592_v62  ;;  %v2290_v27 = vld [vmem:[%s3338_s3 + $0x10] sm:$0xf]  ;;  %v2390_v62 = vld [vmem:[%s3338_s3 + $0x14] sm:$0xf0] }
 0x25e   : > { %1822 = vmatpush.bf16.msra.mxu3 %v1779_v14  ;;  %v1655_v11 = vadd.f32 0.5, %v1591_v41  ;;  %v1721_v19 = vmul.f32 %v1657_v8, %v1359_v21  ;;  %v2291_v41 = vor.u32 %v2390_v62, %v2290_v27  ;;  %v2292_v8 = vld [vmem:[%s3338_s3 + $0x18] sm:$0xf0] }
 0x25f   : > { %v1654_v35 = vadd.f32 0.5, %v1590_v46  ;;  %v1720_v6 = vmul.f32 %v1656_v56, %v3178_v20  ;;  %v2322_v20 = vld [vmem:[%s3338_s3 + $0x50] sm:$0xf]  ;;  %v2388_v46 = vld [vmem:[%s3338_s3 + $0x4] sm:$0xf0] }
 0x260   : > { %v1719_v38 = vmul.f32 %v1655_v11, %v3171_v9  ;;  %v2323_v21 = vor.u32 %v2398_v5, %v2322_v20  ;;  %v2387_v56 = vld [vmem:[%s3338_s3 + $0x4] sm:$0xf] }
 0x261   : > { %v2690_v36 = vpop.eup %2689  ;;  %v1718_v25 = vmul.f32 %v1654_v35, %v3164_v40 }
 0x262   : > { %1823 = vmatpush.bf16.msra.mxu3 %v1778_v10  ;;  %v1594_v0 = vmul.f32 0.5, %v2690_v36  ;;  %v2692_v50 = vpop.eup %2691  ;;  %v1766_v48 = vpack.c.bf16 %v1720_v6, %v1719_v38  ;;  %v2391_v10 = vld [vmem:[%s3338_s3 + $0x24] sm:$0xf]  ;;  %v2389_v36 = vld [vmem:[%s3338_s3 + $0x14] sm:$0xf] }
 0x263   : > { %v1589_v18 = vmul.f32 0.5, %v2692_v50  ;;  %v2303_v23 = vor.u32 %v2391_v10, %v2300_v33  ;;  %v2282_v50 = vld [vmem:[%s3338_s3] sm:$0xf] }
 0x264   : > { %v1658_v42 = vadd.f32 0.5, %v1594_v0  ;;  %v2295_v0 = vor.u32 %v2389_v36, %v2292_v8  ;;  %v2283_v11 = vor.u32 %v2388_v46, %v2282_v50 }
 0x265   : > { %v1653_v29 = vadd.f32 0.5, %v1589_v18 }
 0x266   : > { %1824 = vmatpush.bf16.msra.mxu3 %v1777_v53  ;;  %v1722_v63 = vmul.f32 %v1658_v42, %v1361_v58  ;;  %v2308_v58 = vld [vmem:[%s3338_s3 + $0x38] sm:$0xf0]  ;;  %v2284_v42 = vld [vmem:[%s3338_s3 + $0x8] sm:$0xf0] }
 0x267   : > { %v1717_v53 = vmul.f32 %v1653_v29, %v3162_v4  ;;  %v2332_v4 = vld [vmem:[%s3338_s3 + $0x68] sm:$0xf0]  ;;  %v2311_v14 = vor.u32 %v2393_v54, %v2308_v58  ;;  %v1781_v29 = vld [vmem:[#allocation2] sm:$0x1] }
 0x268   : > { %v1767_v47 = vpack.c.bf16 %v1722_v63, %v1721_v19  ;;  %v2287_v19 = vor.u32 %v2387_v56, %v2284_v42 }
 0x269   : > { %v1765_v32 = vpack.c.bf16 %v1718_v25, %v1717_v53 }
 0x26a   : > { %1825 = vmatpush.bf16.msra.mxu3 %v1776_v51  ;;  %1813 = vmatpush.bf16.msra.mxu2 %v1767_v47  ;;  %v2399_v51 = vld [vmem:[%s3338_s3 + $0x64] sm:$0xf] }
 0x26b   : > { %v2335_v9 = vor.u32 %v2399_v51, %v2332_v4 }
 0x26e   : > { %1826 = vmatpush.bf16.msra.mxu3 %v1775_v16  ;;  %1814 = vmatpush.bf16.msra.mxu2 %v1766_v48  ;;  %v2343_v16 = vor.u32 %v2401_v26, %v2340_v45  ;;  %v1941_v26 = vperm.slane %v1858_v12, 1  ;;  %v1976_v45 = vlaneseq }
 0x270   : > { %vm1978_vm2 = vcmp.lt.s32.totalorder %v1976_v45, 256 }
 0x272   : > { %1827 = vmatpush.bf16.msra.mxu3 %v1774_v57  ;;  %1815 = vmatpush.bf16.msra.mxu2 %v1765_v32  ;;  %v2400_v57 = vld [vmem:[%s3338_s3 + $0x64] sm:$0xf0] }
 0x275   : > { %1816 = vmatmul.bf16.vlgmr.msra.gmra.mxu2 %v2717_v49 }
 0x276   : > { %1828 = vmatpush.bf16.msra.mxu3 %v3341_v1  ;;  %1944 = vmatpush.bf16.msrb.mxu2 %v2339_v39  ;;  %v1940_v39 = vperm.slane %v1858_v12, 0 }
 0x279   : > { %1829 = vmatmul.bf16.vlgmr.msra.gmra.mxu3 %v2717_v49  ;;  %v2331_v49 = vor.u32 %v2400_v57, %v2330_v17 }
 0x27a   : > { %1957 = vmatpush.bf16.msrb.mxu3 %v2343_v16 }
 0x27b   : > { %1945 = vmatpush.bf16.msrb.mxu2 %v2331_v49 }
 0x27e   : > { %1958 = vmatpush.bf16.msrb.mxu3 %v2335_v9 }
 0x27f   : > { %1946 = vmatpush.bf16.msrb.mxu2 %v2323_v21 }
 0x282   : > { %1959 = vmatpush.bf16.msrb.mxu3 %v2327_v55 }
 0x283   : > { %1947 = vmatpush.bf16.msrb.mxu2 %v2315_v7 }
 0x286   : > { %1960 = vmatpush.bf16.msrb.mxu3 %v2319_v24 }
 0x287   : > { %1948 = vmatpush.bf16.msrb.mxu2 %v2307_v59 }
 0x28a   : > { %1961 = vmatpush.bf16.msrb.mxu3 %v2311_v14 }
 0x28b   : > { %1949 = vmatpush.bf16.msrb.mxu2 %v2299_v60 }
 0x28e   : > { %1962 = vmatpush.bf16.msrb.mxu3 %v2303_v23 }
 0x28f   : > { %1950 = vmatpush.bf16.msrb.mxu2 %v2291_v41 }
 0x292   : > { %1963 = vmatpush.bf16.msrb.mxu3 %v2295_v0 }
 0x293   : > { %1951 = vmatpush.bf16.msrb.mxu2 %v2283_v11 }
 0x296   : > { %1964 = vmatpush.bf16.msrb.mxu3 %v2287_v19 }
 0x2b1   : > { %v1791_v40 = vpop.f32.mrf.mxu2 }
 0x2b9   : > { %v1793_v13 = vpop.f32.mrf.mxu2 }
 0x2dc   : > { %v1804_v28 = vpop.f32.mrf.mxu3 }
 0x2dd   : > { %v1805_v63 = vadd.f32 %v1804_v28, %v1791_v40 }
 0x2e4   : > { %v1806_v18 = vpop.f32.mrf.mxu3 }
 0x2f8   : > { %v1817_v35 = vpop.f32.mrf.mxu2 }
 0x2f9   : > { %v1818_v6 = vadd.f32 %v1817_v35, %v1805_v63 }
 0x2fc   : > { %v1830_v47 = vpop.f32.mrf.mxu3 }
 0x2fd   : > { %v1831_v38 = vadd.f32 %v1830_v47, %v1818_v6 }
 0x2ff   : > { %v1834_v25 = vadd.f32 %v1831_v38, %v1781_v29 }
 0x300   : > { %v1819_v48 = vpop.f32.mrf.mxu2 }
 0x301   : > { %1835 = vst [vmem:[#allocation2] sm:$0x1] %v1834_v25 }
 0x304   : > { %v1832_v53 = vpop.f32.mrf.mxu3 }
 0x308   : > { %v1839_v32 = vld [vmem:[#allocation2] sm:$0x1] }
 0x309   : > { %v1840_v1 = vmul.f32 0.0044444446, %v1839_v32 }
 0x30b   : > { %v1841_v52 = vpack.c.bf16 %v1840_v1, %v1840_v1 }
 0x30d   : > { %1952 = vmatmul.bf16.vlgmr.msrb.gmra.mxu2 %v1841_v52  ;;  %1965 = vmatmul.bf16.vlgmr.msrb.gmra.mxu3 %v1841_v52 }
 0x390   : > { %v1953_v17 = vpop.f32.mrf.mxu2  ;;  %v1966_v57 = vpop.f32.mrf.mxu3 }
 0x391   : > { %v1967_v16 = vadd.f32 %v1966_v57, %v1941_v26  ;;  %v1954_v51 = vadd.f32 %v1953_v17, %v1940_v39 }
 0x393   : > { %v1972_v4 = vrot.slane %v1967_v16, 7 }
 0x395   : > { %v1974_v40 = vsel %vm1973_vm1, %v1954_v51, %v1972_v4 }
 0x396   : > { %1980 = vst.msk [vmem:[%s250_s27] sm:$0x3] %vm1978_vm2, %v1974_v40 }
 0x398   : > { %v1955_v49 = vpop.f32.mrf.mxu2  ;;  %v1968_v9 = vpop.f32.mrf.mxu3 }
 0x399 PF: > { %s15_s20 = sadd.s32 1, %s2715_s20   ;;  %s3342_s18 = smov %s2711_s19 }
 0x39a   : > { %p12_p5 = scmp.ge.s32.totalorder %s15_s20, 4   ;;  %s3343_s19 = smov %s3345_s21 }
 0x39c   :  { %14 = sbr.rel (!%p12_p5) target bundleno = 2 (0x2), region = 78 }

</bundles_post_ra>
